<compile_context>
chip_gen: v7x
topology: tpu7x:2x2x1
jax: 0.10.0
libtpu: 0.0.40
codegen_flags: <defaults>
</compile_context>

<pallas_src>
import functools

import numpy as np
import jax
import jax.numpy as jnp
from jax.experimental import pallas as pl
from jax.experimental.pallas import tpu as pltpu

VMEM_SPEC = pl.BlockSpec(memory_space=pltpu.MemorySpace.VMEM)


def _elu(x):
    # ELU with clamped exp argument (avoids inf in the unselected branch).
    return jnp.where(x > 0.0, x, jnp.exp(jnp.minimum(x, 0.0)) - 1.0)


# ----------------------------------------------------------------------------
# Fused forward kernel: featurizers + GIN layers + BN/ELU + prediction MLP
# ----------------------------------------------------------------------------
def _fused_graph_kernel(*refs, num_layer, x_features, edge_features, emb):
    # ---- parse refs (inputs..., output) ----
    src_ref, dst_ref, sup_ref, x_ref, eattr_ref = refs[0:5]
    xw1, xb1, xw2, xb2 = refs[5:9]          # node featurizer (flattened)
    ew1, eb1, ew2, eb2 = refs[9:13]         # edge featurizer, fused over layers
    layer_refs = refs[13:13 + 4 * num_layer]
    pred_off = 13 + 4 * num_layer
    pw1, pb1, pw2, pb2 = refs[pred_off:pred_off + 4]
    out_ref = refs[pred_off + 4]

    N = x_ref.shape[0]
    E_raw = eattr_ref.shape[0]
    n_graphs = sup_ref.shape[0]
    H2 = 2 * emb
    L = num_layer
    f32, bf16 = jnp.float32, jnp.bfloat16

    def mxdot(a, b):
        # bf16 MXU operands, f32 accumulation. astype is a no-op for
        # operands that are already bf16 (constants / pre-cast weights).
        return jnp.dot(a.astype(bf16), b.astype(bf16),
                       preferred_element_type=f32)

    def expand_mat(nfeat, copies):
        # Replication matrix (nfeat, copies*nfeat*H2), bf16, built in-register:
        # for every copy c, E[i, c*nfeat*H2 + i*H2 : ... + H2] = 1.
        total = copies * nfeat * H2
        row = jax.lax.broadcasted_iota(jnp.int32, (nfeat, total), 0) * H2
        col = jax.lax.broadcasted_iota(jnp.int32, (nfeat, total), 1)
        m = jnp.zeros((nfeat, total), dtype=jnp.bool_)
        for c in range(copies):                       # compile-time loop
            start = row + c * nfeat * H2
            m = jnp.logical_or(m, jnp.logical_and(col >= start, col < start + H2))
        return m.astype(bf16)

    # ---- graph topology (built once, bf16, self-loops folded into A) ----
    # smat[n, e]  = 1 if dst[e] == n   (scatter/aggregation)
    # gmatT[m, e] = 1 if src[e] == m   (gather, transposed)
    node_iota = jax.lax.broadcasted_iota(jnp.int32, (N, E_raw), 0)
    smat = (node_iota == dst_ref[...]).astype(bf16)
    gmatT = (node_iota == src_ref[...]).astype(bf16)
    eye = (jax.lax.broadcasted_iota(jnp.int32, (N, N), 0)
           == jax.lax.broadcasted_iota(jnp.int32, (N, N), 1)).astype(f32)
    # A[n, m] = #edges m->n + self-loop;  computed as smat @ gmatT^T ("NT" dot)
    adj = jax.lax.dot_general(smat, gmatT, (((1,), (1,)), ((), ())),
                              preferred_element_type=f32) + eye
    adj = adj.astype(bf16)                                        # reused L times

    # ---- node featurizer: sum_i MLP_i(x[:, i]) as one block matmul ----
    exp_x = expand_mat(x_features, 1)                             # (Fx, Fx*H2)
    rep_x = mxdot(x_ref[...], exp_x)                              # (N, Fx*H2)
    hid_x = jnp.maximum(rep_x * xw1[...] + xb1[...], 0.0)
    h = mxdot(hid_x, xw2[...]) + xb2[...]                         # (N, emb)

    # ---- edge featurizer for ALL layers at once (h-independent, hoisted) ----
    # rep is tiled per layer directly by the expand matrix; the output matmul
    # uses the block-diagonal stack of per-layer w2 -> (E_raw, L*emb).
    exp_e = expand_mat(edge_features, L)                          # (Fe, L*Fe*H2)
    rep_e = mxdot(eattr_ref[...], exp_e)                          # (E_raw, L*Fe*H2)
    # Self-loop edge_attr row = [8, 0, ..., 0]; its tiled rep is 8 * (row 0 of exp_e).
    rep_sl = exp_e[0:1, :].astype(f32) * 8.0                      # (1, L*Fe*H2)
    hid_e = jnp.maximum(rep_e * ew1[...] + eb1[...], 0.0)
    hid_sl = jnp.maximum(rep_sl * ew1[...] + eb1[...], 0.0)
    eemb_e = mxdot(hid_e, ew2[...]) + eb2[...]                    # (E_raw, L*emb)
    eemb_sl = mxdot(hid_sl, ew2[...]) + eb2[...]                  # (1, L*emb)
    # Aggregated edge contribution per node (one scatter matmul for all layers);
    # every node has exactly one self-loop edge, so its embedding broadcasts.
    aggr_e = mxdot(smat, eemb_e) + eemb_sl                        # (N, L*emb)

    # ---- GIN layers ----
    for l in range(num_layer):
        mw1, mb1, mw2, mb2 = layer_refs[4 * l: 4 * l + 4]
        # propagate (aggr='add'):  aggr[n] = sum_{e: dst==n} (h[src[e]] + eemb_l[e])
        aggr = mxdot(adj, h) + aggr_e[:, l * emb:(l + 1) * emb]
        # GIN update MLP: Linear(E,2E) -> ReLU -> Linear(2E,E)
        hid = jnp.maximum(mxdot(aggr, mw1[...]) + mb1[...], 0.0)
        h = mxdot(hid, mw2[...]) + mb2[...]
        # BatchNorm1d (training-mode batch stats, gamma=1, beta=0)
        mean = jnp.mean(h, axis=0, keepdims=True)
        var = jnp.mean((h - mean) ** 2, axis=0, keepdims=True)
        h = (h - mean) * jax.lax.rsqrt(var + 1e-5)
        if l != num_layer - 1:
            h = _elu(h)          # ELU for all but last layer; dropout identity (p=0)

    # ---- super-node gather (last node of each graph) + prediction MLP ----
    sel = (jax.lax.broadcasted_iota(jnp.int32, (n_graphs, N), 1)
           == sup_ref[...]).astype(bf16)
    srep = mxdot(sel, h)                                          # (G, emb)
    ph = _elu(mxdot(srep, pw1[...]) + pb1[...])                   # (G, emb//2)
    out_ref[...] = mxdot(ph, pw2[...]) + pb2[...]                 # (G, num_tasks)


# ----------------------------------------------------------------------------
# Parameter initialization (deterministic; matmul weights stored in bf16,
# per-feature MLPs pre-flattened, edge featurizer fused across layers)
# ----------------------------------------------------------------------------
def glorot(key, shape):
    fan_in, fan_out = shape[-2], shape[-1]
    limit = (6.0 / (fan_in + fan_out)) ** 0.5
    return jax.random.uniform(key, shape, jnp.float32, -limit, limit)


def init_feat_mlp(key, num_feat, emb):
    # per-feature scalar MLP: Linear(1,2E) -> ReLU -> Linear(2E,E), summed.
    # Stored pre-flattened for the block-matmul formulation:
    #   w1 (1, F*2E), b1 (1, F*2E), w2 (F*2E, E), b2sum (1, E)
    k1, k2, k3, k4 = jax.random.split(key, 4)
    w1 = glorot(k1, (num_feat, 2 * emb))
    b1 = 0.01 * jax.random.normal(k2, (num_feat, 2 * emb), jnp.float32)
    w2 = glorot(k3, (num_feat, 2 * emb, emb))
    b2 = 0.01 * jax.random.normal(k4, (num_feat, emb), jnp.float32)
    return (w1.reshape(1, -1), b1.reshape(1, -1),
            w2.reshape(num_feat * 2 * emb, emb),
            jnp.sum(b2, axis=0, keepdims=True))


def _block_diag(blocks):
    out_cols = sum(b.shape[1] for b in blocks)
    rows, col = [], 0
    for b in blocks:
        padded = jnp.zeros((b.shape[0], out_cols), b.dtype)
        padded = padded.at[:, col:col + b.shape[1]].set(b)
        rows.append(padded)
        col += b.shape[1]
    return jnp.concatenate(rows, axis=0)


def init_params(key, num_layer, emb, num_tasks, x_features, edge_features):
    bf16 = jnp.bfloat16
    keys = jax.random.split(key, 2 + num_layer)

    xw1, xb1, xw2, xb2 = init_feat_mlp(keys[0], x_features, emb)
    params = {"x_mlp": (xw1, xb1, xw2.astype(bf16), xb2)}

    e_w1, e_b1, e_w2, e_b2 = [], [], [], []
    gin_layers = []
    for l in range(num_layer):
        k = jax.random.split(keys[1 + l], 3)
        w1, b1, w2, b2 = init_feat_mlp(k[0], edge_features, emb)
        e_w1.append(w1); e_b1.append(b1); e_w2.append(w2); e_b2.append(b2)
        gin_layers.append((                              # GIN update MLP
            glorot(k[1], (emb, 2 * emb)).astype(bf16),
            jnp.zeros((1, 2 * emb), jnp.float32),
            glorot(k[2], (2 * emb, emb)).astype(bf16),
            jnp.zeros((1, emb), jnp.float32),
        ))
    # Edge featurizer fused across layers: concatenated w1/b1/b2, block-diag w2.
    params["edge_mlp"] = (
        jnp.concatenate(e_w1, axis=1),                   # (1, L*Fe*2E)  f32
        jnp.concatenate(e_b1, axis=1),                   # (1, L*Fe*2E)  f32
        _block_diag(e_w2).astype(bf16),                  # (L*Fe*2E, L*E) bf16
        jnp.concatenate(e_b2, axis=1),                   # (1, L*E)      f32
    )
    params["gin_layers"] = gin_layers

    kp = jax.random.split(keys[1 + num_layer], 2)
    params["pred"] = (                                   # Linear(E,E//2)->ELU->Linear(E//2,T)
        glorot(kp[0], (emb, emb // 2)).astype(bf16),
        jnp.zeros((1, emb // 2), jnp.float32),
        glorot(kp[1], (emb // 2, num_tasks)).astype(bf16),
        jnp.zeros((1, num_tasks), jnp.float32),
    )
    return params


# ----------------------------------------------------------------------------
# Forward wrapper: single fused pallas_call (topology prep lives in-kernel)
# ----------------------------------------------------------------------------
@jax.jit
def graph_model_forward(params, x, src, dst, edge_attr, super_idx):
    num_nodes, x_features = x.shape
    num_edges, edge_features = edge_attr.shape
    emb = params["x_mlp"][2].shape[1]
    num_tasks = params["pred"][2].shape[1]
    num_layer = len(params["gin_layers"])
    n_graphs = super_idx.shape[0]

    # lane-major index rows (no concat / scatter-set in the wrapper)
    src_row = src.astype(jnp.int32).reshape(1, -1)
    dst_row = dst.astype(jnp.int32).reshape(1, -1)
    sup_col = super_idx.astype(jnp.int32).reshape(-1, 1)

    inputs = [src_row, dst_row, sup_col, x, edge_attr]
    inputs += list(params["x_mlp"])
    inputs += list(params["edge_mlp"])
    for layer in params["gin_layers"]:
        inputs += list(layer)
    inputs += list(params["pred"])

    kernel = functools.partial(
        _fused_graph_kernel, num_layer=num_layer,
        x_features=x_features, edge_features=edge_features, emb=emb)

    # Advisory cost estimate for the XLA scheduler.
    H2 = 2 * emb
    Kx = x_features * H2
    Ke = num_layer * edge_features * H2
    LE = num_layer * emb
    flops = 2 * (
        num_nodes * num_nodes * num_edges                       # adjacency A
        + num_nodes * x_features * Kx + num_nodes * Kx * emb    # node featurizer
        + num_edges * edge_features * Ke                        # edge rep
        + (num_edges + 1) * Ke * LE                             # edge embeddings
        + num_nodes * num_edges * LE                            # edge scatter
        + num_layer * (num_nodes * num_nodes * emb              # A @ h
                       + num_nodes * emb * H2 + num_nodes * H2 * emb)
        + n_graphs * num_nodes * emb                            # super gather
        + n_graphs * emb * (emb // 2) + n_graphs * (emb // 2) * num_tasks)
    transcendentals = ((num_layer - 1) * num_nodes * emb
                       + n_graphs * (emb // 2) + num_layer * emb)
    bytes_accessed = (sum(int(np.prod(a.shape)) * a.dtype.itemsize for a in inputs)
                      + n_graphs * num_tasks * 4)

    # TODO(synk): for batched multi-molecule inference on v7x, add a leading
    # "parallel" grid axis over graphs (2nd TensorCore) and tile the edge
    # dimension with an accumulated aggr to keep the dense one-hots in VMEM.
    return pl.pallas_call(
        kernel,
        out_shape=jax.ShapeDtypeStruct((n_graphs, num_tasks), jnp.float32),
        in_specs=[VMEM_SPEC] * len(inputs),
        out_specs=VMEM_SPEC,
        compiler_params=pltpu.CompilerParams(vmem_limit_bytes=32 * 1024 * 1024),
        cost_estimate=pl.CostEstimate(flops=flops,
                                      transcendentals=transcendentals,
                                      bytes_accessed=bytes_accessed),
    )(*inputs)


if __name__ == "__main__":
    num_layer, emb_dim, num_tasks = 2, 32, 3
    x_features, edge_features = 7, 5

    key = jax.random.PRNGKey(0)
    kx, ke, kp = jax.random.split(key, 3)

    # Two graphs of 6 nodes each, ring topology, bidirectional edges.
    nodes_per_graph, num_graphs = 6, 2
    num_nodes = nodes_per_graph * num_graphs
    src_list, dst_list = [], []
    for g in range(num_graphs):
        off = g * nodes_per_graph
        for i in range(nodes_per_graph):
            j = (i + 1) % nodes_per_graph
            src_list += [off + i, off + j]
            dst_list += [off + j, off + i]
    src = jnp.asarray(src_list, jnp.int32)
    dst = jnp.asarray(dst_list, jnp.int32)

    x = jax.random.uniform(kx, (num_nodes, x_features), jnp.float32, 0.0, 4.0)
    edge_attr = jax.random.uniform(ke, (src.shape[0], edge_features),
                                   jnp.float32, 0.0, 3.0)
    batch = np.repeat(np.arange(num_graphs), nodes_per_graph)

    # super_node_rep boundary indices (last node of each graph), host-side
    super_idx = np.array(
        [i for i in range(num_nodes)
         if i == num_nodes - 1 or batch[i] != batch[i + 1]], dtype=np.int32)

    params = init_params(kp, num_layer, emb_dim, num_tasks,
                         x_features, edge_features)

    out = graph_model_forward(params, x, src, dst, edge_attr,
                              jnp.asarray(super_idx))
    jax.block_until_ready(out)
    assert out.shape == (num_graphs, num_tasks)
    assert bool(jnp.all(jnp.isfinite(out)))
    print("KERNEL_OK")
</pallas_src>

<mosaic_0001>
module attributes {stable_mosaic.version = 11 : i64} {
  func.func @_fused_graph_kernel(%arg0: memref<1x24xi32, #tpu.memory_space<vmem>>, %arg1: memref<1x24xi32, #tpu.memory_space<vmem>>, %arg2: memref<2x1xi32, #tpu.memory_space<vmem>>, %arg3: memref<12x7xf32, #tpu.memory_space<vmem>>, %arg4: memref<24x5xf32, #tpu.memory_space<vmem>>, %arg5: memref<1x448xf32, #tpu.memory_space<vmem>>, %arg6: memref<1x448xf32, #tpu.memory_space<vmem>>, %arg7: memref<448x32xbf16, #tpu.memory_space<vmem>>, %arg8: memref<1x32xf32, #tpu.memory_space<vmem>>, %arg9: memref<1x640xf32, #tpu.memory_space<vmem>>, %arg10: memref<1x640xf32, #tpu.memory_space<vmem>>, %arg11: memref<640x64xbf16, #tpu.memory_space<vmem>>, %arg12: memref<1x64xf32, #tpu.memory_space<vmem>>, %arg13: memref<32x64xbf16, #tpu.memory_space<vmem>>, %arg14: memref<1x64xf32, #tpu.memory_space<vmem>>, %arg15: memref<64x32xbf16, #tpu.memory_space<vmem>>, %arg16: memref<1x32xf32, #tpu.memory_space<vmem>>, %arg17: memref<32x64xbf16, #tpu.memory_space<vmem>>, %arg18: memref<1x64xf32, #tpu.memory_space<vmem>>, %arg19: memref<64x32xbf16, #tpu.memory_space<vmem>>, %arg20: memref<1x32xf32, #tpu.memory_space<vmem>>, %arg21: memref<32x16xbf16, #tpu.memory_space<vmem>>, %arg22: memref<1x16xf32, #tpu.memory_space<vmem>>, %arg23: memref<16x3xbf16, #tpu.memory_space<vmem>>, %arg24: memref<1x3xf32, #tpu.memory_space<vmem>>, %arg25: memref<2x3xf32, #tpu.memory_space<vmem>>) attributes {dimension_semantics = [], scalar_prefetch = 0 : i64, scratch_operands = 0 : i64, tpu.core_type = #tpu.core_type<tc>} {
    %0 = tpu.iota {dimensions = array<i32: 0>} : vector<12x24xi32>
    %c0 = arith.constant 0 : index
    %c0_0 = arith.constant 0 : index
    %1 = vector.load %arg1[%c0, %c0_0] : memref<1x24xi32, #tpu.memory_space<vmem>>, vector<1x24xi32>
    %2 = vector.broadcast %1 : vector<1x24xi32> to vector<12x24xi32>
    %3 = arith.cmpi eq, %0, %2 : vector<12x24xi32>
    %4 = arith.extui %3 : vector<12x24xi1> to vector<12x24xi32>
    %5 = arith.sitofp %4 : vector<12x24xi32> to vector<12x24xf32>
    %6 = arith.truncf %5 : vector<12x24xf32> to vector<12x24xbf16>
    %c0_1 = arith.constant 0 : index
    %c0_2 = arith.constant 0 : index
    %7 = vector.load %arg0[%c0_1, %c0_2] : memref<1x24xi32, #tpu.memory_space<vmem>>, vector<1x24xi32>
    %8 = vector.broadcast %7 : vector<1x24xi32> to vector<12x24xi32>
    %9 = arith.cmpi eq, %0, %8 : vector<12x24xi32>
    %10 = arith.extui %9 : vector<12x24xi1> to vector<12x24xi32>
    %11 = arith.sitofp %10 : vector<12x24xi32> to vector<12x24xf32>
    %12 = arith.truncf %11 : vector<12x24xf32> to vector<12x24xbf16>
    %13 = tpu.iota {dimensions = array<i32: 0>} : vector<12x12xi32>
    %14 = tpu.iota {dimensions = array<i32: 1>} : vector<12x12xi32>
    %15 = arith.cmpi eq, %13, %14 : vector<12x12xi32>
    %16 = arith.extui %15 : vector<12x12xi1> to vector<12x12xi32>
    %17 = arith.sitofp %16 : vector<12x12xi32> to vector<12x12xf32>
    %cst = arith.constant dense<0.000000e+00> : vector<12x12xf32>
    %18 = tpu.matmul %6, %12, %cst {dimension_numbers = #tpu.dot_dimension_numbers<[1], [1], [0], [0], [0, 0, 1, 0], [], []>} : vector<12x24xbf16>, vector<12x24xbf16>, vector<12x12xf32> -> vector<12x12xf32>
    %19 = arith.addf %18, %17 : vector<12x12xf32>
    %20 = arith.truncf %19 : vector<12x12xf32> to vector<12x12xbf16>
    %21 = tpu.iota {dimensions = array<i32: 0>} : vector<7x448xi32>
    %c64_i32 = arith.constant 64 : i32
    %22 = vector.broadcast %c64_i32 : i32 to vector<7x448xi32>
    %23 = arith.muli %21, %22 : vector<7x448xi32>
    %24 = tpu.iota {dimensions = array<i32: 1>} : vector<7x448xi32>
    %false = arith.constant false
    %25 = vector.broadcast %false : i1 to vector<7x448xi1>
    %c0_i32 = arith.constant 0 : i32
    %26 = vector.broadcast %c0_i32 : i32 to vector<7x448xi32>
    %27 = arith.addi %23, %26 : vector<7x448xi32>
    %28 = arith.cmpi sge, %24, %27 : vector<7x448xi32>
    %c64_i32_3 = arith.constant 64 : i32
    %29 = vector.broadcast %c64_i32_3 : i32 to vector<7x448xi32>
    %30 = arith.addi %27, %29 : vector<7x448xi32>
    %31 = arith.cmpi slt, %24, %30 : vector<7x448xi32>
    %32 = arith.andi %28, %31 : vector<7x448xi1>
    %33 = arith.ori %25, %32 : vector<7x448xi1>
    %34 = arith.extui %33 : vector<7x448xi1> to vector<7x448xi32>
    %35 = arith.sitofp %34 : vector<7x448xi32> to vector<7x448xf32>
    %36 = arith.truncf %35 : vector<7x448xf32> to vector<7x448xbf16>
    %c0_4 = arith.constant 0 : index
    %c0_5 = arith.constant 0 : index
    %37 = vector.load %arg3[%c0_4, %c0_5] : memref<12x7xf32, #tpu.memory_space<vmem>>, vector<12x7xf32>
    %38 = arith.truncf %37 : vector<12x7xf32> to vector<12x7xbf16>
    %cst_6 = arith.constant dense<0.000000e+00> : vector<12x448xf32>
    %39 = tpu.matmul %38, %36, %cst_6 {dimension_numbers = #tpu.dot_dimension_numbers<[1], [0], [0], [1], [0, 0, 1, 1], [], []>} : vector<12x7xbf16>, vector<7x448xbf16>, vector<12x448xf32> -> vector<12x448xf32>
    %c0_7 = arith.constant 0 : index
    %c0_8 = arith.constant 0 : index
    %40 = vector.load %arg5[%c0_7, %c0_8] : memref<1x448xf32, #tpu.memory_space<vmem>>, vector<1x448xf32>
    %41 = vector.broadcast %40 : vector<1x448xf32> to vector<12x448xf32>
    %42 = arith.mulf %39, %41 : vector<12x448xf32>
    %c0_9 = arith.constant 0 : index
    %c0_10 = arith.constant 0 : index
    %43 = vector.load %arg6[%c0_9, %c0_10] : memref<1x448xf32, #tpu.memory_space<vmem>>, vector<1x448xf32>
    %44 = vector.broadcast %43 : vector<1x448xf32> to vector<12x448xf32>
    %45 = arith.addf %42, %44 : vector<12x448xf32>
    %cst_11 = arith.constant 0.000000e+00 : f32
    %46 = vector.broadcast %cst_11 : f32 to vector<12x448xf32>
    %47 = arith.maximumf %45, %46 : vector<12x448xf32>
    %c0_12 = arith.constant 0 : index
    %c0_13 = arith.constant 0 : index
    %48 = vector.load %arg7[%c0_12, %c0_13] : memref<448x32xbf16, #tpu.memory_space<vmem>>, vector<448x32xbf16>
    %49 = arith.truncf %47 : vector<12x448xf32> to vector<12x448xbf16>
    %cst_14 = arith.constant dense<0.000000e+00> : vector<12x32xf32>
    %50 = tpu.matmul %49, %48, %cst_14 {dimension_numbers = #tpu.dot_dimension_numbers<[1], [0], [0], [1], [0, 0, 1, 1], [], []>} : vector<12x448xbf16>, vector<448x32xbf16>, vector<12x32xf32> -> vector<12x32xf32>
    %c0_15 = arith.constant 0 : index
    %c0_16 = arith.constant 0 : index
    %51 = vector.load %arg8[%c0_15, %c0_16] : memref<1x32xf32, #tpu.memory_space<vmem>>, vector<1x32xf32>
    %52 = vector.broadcast %51 : vector<1x32xf32> to vector<12x32xf32>
    %53 = arith.addf %50, %52 : vector<12x32xf32>
    %54 = tpu.iota {dimensions = array<i32: 0>} : vector<5x640xi32>
    %c64_i32_17 = arith.constant 64 : i32
    %55 = vector.broadcast %c64_i32_17 : i32 to vector<5x640xi32>
    %56 = arith.muli %54, %55 : vector<5x640xi32>
    %57 = tpu.iota {dimensions = array<i32: 1>} : vector<5x640xi32>
    %false_18 = arith.constant false
    %58 = vector.broadcast %false_18 : i1 to vector<5x640xi1>
    %c0_i32_19 = arith.constant 0 : i32
    %59 = vector.broadcast %c0_i32_19 : i32 to vector<5x640xi32>
    %60 = arith.addi %56, %59 : vector<5x640xi32>
    %61 = arith.cmpi sge, %57, %60 : vector<5x640xi32>
    %c64_i32_20 = arith.constant 64 : i32
    %62 = vector.broadcast %c64_i32_20 : i32 to vector<5x640xi32>
    %63 = arith.addi %60, %62 : vector<5x640xi32>
    %64 = arith.cmpi slt, %57, %63 : vector<5x640xi32>
    %65 = arith.andi %61, %64 : vector<5x640xi1>
    %66 = arith.ori %58, %65 : vector<5x640xi1>
    %c320_i32 = arith.constant 320 : i32
    %67 = vector.broadcast %c320_i32 : i32 to vector<5x640xi32>
    %68 = arith.addi %56, %67 : vector<5x640xi32>
    %69 = arith.cmpi sge, %57, %68 : vector<5x640xi32>
    %c64_i32_21 = arith.constant 64 : i32
    %70 = vector.broadcast %c64_i32_21 : i32 to vector<5x640xi32>
    %71 = arith.addi %68, %70 : vector<5x640xi32>
    %72 = arith.cmpi slt, %57, %71 : vector<5x640xi32>
    %73 = arith.andi %69, %72 : vector<5x640xi1>
    %74 = arith.ori %66, %73 : vector<5x640xi1>
    %75 = arith.extui %74 : vector<5x640xi1> to vector<5x640xi32>
    %76 = arith.sitofp %75 : vector<5x640xi32> to vector<5x640xf32>
    %77 = arith.truncf %76 : vector<5x640xf32> to vector<5x640xbf16>
    %c0_22 = arith.constant 0 : index
    %c0_23 = arith.constant 0 : index
    %78 = vector.load %arg4[%c0_22, %c0_23] : memref<24x5xf32, #tpu.memory_space<vmem>>, vector<24x5xf32>
    %79 = arith.truncf %78 : vector<24x5xf32> to vector<24x5xbf16>
    %cst_24 = arith.constant dense<0.000000e+00> : vector<24x640xf32>
    %80 = tpu.matmul %79, %77, %cst_24 {dimension_numbers = #tpu.dot_dimension_numbers<[1], [0], [0], [1], [0, 0, 1, 1], [], []>} : vector<24x5xbf16>, vector<5x640xbf16>, vector<24x640xf32> -> vector<24x640xf32>
    %81 = vector.extract_strided_slice %77 {offsets = [0, 0], sizes = [1, 640], strides = [1, 1]} : vector<5x640xbf16> to vector<1x640xbf16>
    %82 = arith.extf %81 : vector<1x640xbf16> to vector<1x640xf32>
    %cst_25 = arith.constant 8.000000e+00 : f32
    %83 = vector.broadcast %cst_25 : f32 to vector<1x640xf32>
    %84 = arith.mulf %82, %83 : vector<1x640xf32>
    %c0_26 = arith.constant 0 : index
    %c0_27 = arith.constant 0 : index
    %85 = vector.load %arg9[%c0_26, %c0_27] : memref<1x640xf32, #tpu.memory_space<vmem>>, vector<1x640xf32>
    %86 = vector.broadcast %85 : vector<1x640xf32> to vector<24x640xf32>
    %87 = arith.mulf %80, %86 : vector<24x640xf32>
    %c0_28 = arith.constant 0 : index
    %c0_29 = arith.constant 0 : index
    %88 = vector.load %arg10[%c0_28, %c0_29] : memref<1x640xf32, #tpu.memory_space<vmem>>, vector<1x640xf32>
    %89 = vector.broadcast %88 : vector<1x640xf32> to vector<24x640xf32>
    %90 = arith.addf %87, %89 : vector<24x640xf32>
    %cst_30 = arith.constant 0.000000e+00 : f32
    %91 = vector.broadcast %cst_30 : f32 to vector<24x640xf32>
    %92 = arith.maximumf %90, %91 : vector<24x640xf32>
    %c0_31 = arith.constant 0 : index
    %c0_32 = arith.constant 0 : index
    %93 = vector.load %arg9[%c0_31, %c0_32] : memref<1x640xf32, #tpu.memory_space<vmem>>, vector<1x640xf32>
    %94 = arith.mulf %84, %93 : vector<1x640xf32>
    %c0_33 = arith.constant 0 : index
    %c0_34 = arith.constant 0 : index
    %95 = vector.load %arg10[%c0_33, %c0_34] : memref<1x640xf32, #tpu.memory_space<vmem>>, vector<1x640xf32>
    %96 = arith.addf %94, %95 : vector<1x640xf32>
    %cst_35 = arith.constant 0.000000e+00 : f32
    %97 = vector.broadcast %cst_35 : f32 to vector<1x640xf32>
    %98 = arith.maximumf %96, %97 : vector<1x640xf32>
    %c0_36 = arith.constant 0 : index
    %c0_37 = arith.constant 0 : index
    %99 = vector.load %arg11[%c0_36, %c0_37] : memref<640x64xbf16, #tpu.memory_space<vmem>>, vector<640x64xbf16>
    %100 = arith.truncf %92 : vector<24x640xf32> to vector<24x640xbf16>
    %cst_38 = arith.constant dense<0.000000e+00> : vector<24x64xf32>
    %101 = tpu.matmul %100, %99, %cst_38 {dimension_numbers = #tpu.dot_dimension_numbers<[1], [0], [0], [1], [0, 0, 1, 1], [], []>} : vector<24x640xbf16>, vector<640x64xbf16>, vector<24x64xf32> -> vector<24x64xf32>
    %c0_39 = arith.constant 0 : index
    %c0_40 = arith.constant 0 : index
    %102 = vector.load %arg12[%c0_39, %c0_40] : memref<1x64xf32, #tpu.memory_space<vmem>>, vector<1x64xf32>
    %103 = vector.broadcast %102 : vector<1x64xf32> to vector<24x64xf32>
    %104 = arith.addf %101, %103 : vector<24x64xf32>
    %c0_41 = arith.constant 0 : index
    %c0_42 = arith.constant 0 : index
    %105 = vector.load %arg11[%c0_41, %c0_42] : memref<640x64xbf16, #tpu.memory_space<vmem>>, vector<640x64xbf16>
    %106 = arith.truncf %98 : vector<1x640xf32> to vector<1x640xbf16>
    %cst_43 = arith.constant dense<0.000000e+00> : vector<1x64xf32>
    %107 = tpu.matmul %106, %105, %cst_43 {dimension_numbers = #tpu.dot_dimension_numbers<[1], [0], [0], [1], [0, 0, 1, 1], [], []>} : vector<1x640xbf16>, vector<640x64xbf16>, vector<1x64xf32> -> vector<1x64xf32>
    %c0_44 = arith.constant 0 : index
    %c0_45 = arith.constant 0 : index
    %108 = vector.load %arg12[%c0_44, %c0_45] : memref<1x64xf32, #tpu.memory_space<vmem>>, vector<1x64xf32>
    %109 = arith.addf %107, %108 : vector<1x64xf32>
    %110 = arith.truncf %104 : vector<24x64xf32> to vector<24x64xbf16>
    %cst_46 = arith.constant dense<0.000000e+00> : vector<12x64xf32>
    %111 = tpu.matmul %6, %110, %cst_46 {dimension_numbers = #tpu.dot_dimension_numbers<[1], [0], [0], [1], [0, 0, 1, 1], [], []>} : vector<12x24xbf16>, vector<24x64xbf16>, vector<12x64xf32> -> vector<12x64xf32>
    %112 = vector.broadcast %109 : vector<1x64xf32> to vector<12x64xf32>
    %113 = arith.addf %111, %112 : vector<12x64xf32>
    %114 = arith.truncf %53 : vector<12x32xf32> to vector<12x32xbf16>
    %cst_47 = arith.constant dense<0.000000e+00> : vector<12x32xf32>
    %115 = tpu.matmul %20, %114, %cst_47 {dimension_numbers = #tpu.dot_dimension_numbers<[1], [0], [0], [1], [0, 0, 1, 1], [], []>} : vector<12x12xbf16>, vector<12x32xbf16>, vector<12x32xf32> -> vector<12x32xf32>
    %116 = vector.extract_strided_slice %113 {offsets = [0, 0], sizes = [12, 32], strides = [1, 1]} : vector<12x64xf32> to vector<12x32xf32>
    %117 = arith.addf %115, %116 : vector<12x32xf32>
    %c0_48 = arith.constant 0 : index
    %c0_49 = arith.constant 0 : index
    %118 = vector.load %arg13[%c0_48, %c0_49] : memref<32x64xbf16, #tpu.memory_space<vmem>>, vector<32x64xbf16>
    %119 = arith.truncf %117 : vector<12x32xf32> to vector<12x32xbf16>
    %cst_50 = arith.constant dense<0.000000e+00> : vector<12x64xf32>
    %120 = tpu.matmul %119, %118, %cst_50 {dimension_numbers = #tpu.dot_dimension_numbers<[1], [0], [0], [1], [0, 0, 1, 1], [], []>} : vector<12x32xbf16>, vector<32x64xbf16>, vector<12x64xf32> -> vector<12x64xf32>
    %c0_51 = arith.constant 0 : index
    %c0_52 = arith.constant 0 : index
    %121 = vector.load %arg14[%c0_51, %c0_52] : memref<1x64xf32, #tpu.memory_space<vmem>>, vector<1x64xf32>
    %122 = vector.broadcast %121 : vector<1x64xf32> to vector<12x64xf32>
    %123 = arith.addf %120, %122 : vector<12x64xf32>
    %cst_53 = arith.constant 0.000000e+00 : f32
    %124 = vector.broadcast %cst_53 : f32 to vector<12x64xf32>
    %125 = arith.maximumf %123, %124 : vector<12x64xf32>
    %c0_54 = arith.constant 0 : index
    %c0_55 = arith.constant 0 : index
    %126 = vector.load %arg15[%c0_54, %c0_55] : memref<64x32xbf16, #tpu.memory_space<vmem>>, vector<64x32xbf16>
    %127 = arith.truncf %125 : vector<12x64xf32> to vector<12x64xbf16>
    %cst_56 = arith.constant dense<0.000000e+00> : vector<12x32xf32>
    %128 = tpu.matmul %127, %126, %cst_56 {dimension_numbers = #tpu.dot_dimension_numbers<[1], [0], [0], [1], [0, 0, 1, 1], [], []>} : vector<12x64xbf16>, vector<64x32xbf16>, vector<12x32xf32> -> vector<12x32xf32>
    %c0_57 = arith.constant 0 : index
    %c0_58 = arith.constant 0 : index
    %129 = vector.load %arg16[%c0_57, %c0_58] : memref<1x32xf32, #tpu.memory_space<vmem>>, vector<1x32xf32>
    %130 = vector.broadcast %129 : vector<1x32xf32> to vector<12x32xf32>
    %131 = arith.addf %128, %130 : vector<12x32xf32>
    %cst_59 = arith.constant dense<0.000000e+00> : vector<32xf32>
    %132 = vector.multi_reduction <add>, %131, %cst_59 [0] : vector<12x32xf32> to vector<32xf32>
    %133 = vector.shape_cast %132 : vector<32xf32> to vector<1x32xf32>
    %cst_60 = arith.constant 1.200000e+01 : f32
    %134 = vector.broadcast %cst_60 : f32 to vector<1x32xf32>
    %135 = arith.divf %133, %134 : vector<1x32xf32>
    %136 = vector.broadcast %135 : vector<1x32xf32> to vector<12x32xf32>
    %137 = arith.subf %131, %136 : vector<12x32xf32>
    %138 = arith.mulf %137, %137 : vector<12x32xf32>
    %cst_61 = arith.constant dense<0.000000e+00> : vector<32xf32>
    %139 = vector.multi_reduction <add>, %138, %cst_61 [0] : vector<12x32xf32> to vector<32xf32>
    %140 = vector.shape_cast %139 : vector<32xf32> to vector<1x32xf32>
    %cst_62 = arith.constant 1.200000e+01 : f32
    %141 = vector.broadcast %cst_62 : f32 to vector<1x32xf32>
    %142 = arith.divf %140, %141 : vector<1x32xf32>
    %143 = vector.broadcast %135 : vector<1x32xf32> to vector<12x32xf32>
    %144 = arith.subf %131, %143 : vector<12x32xf32>
    %cst_63 = arith.constant 9.99999974E-6 : f32
    %145 = vector.broadcast %cst_63 : f32 to vector<1x32xf32>
    %146 = arith.addf %142, %145 : vector<1x32xf32>
    %147 = math.rsqrt %146 : vector<1x32xf32>
    %148 = vector.broadcast %147 : vector<1x32xf32> to vector<12x32xf32>
    %149 = arith.mulf %144, %148 : vector<12x32xf32>
    %cst_64 = arith.constant 0.000000e+00 : f32
    %150 = vector.broadcast %cst_64 : f32 to vector<12x32xf32>
    %151 = arith.cmpf ogt, %149, %150 : vector<12x32xf32>
    %cst_65 = arith.constant 0.000000e+00 : f32
    %152 = vector.broadcast %cst_65 : f32 to vector<12x32xf32>
    %153 = arith.minimumf %149, %152 : vector<12x32xf32>
    %154 = math.exp %153 : vector<12x32xf32>
    %cst_66 = arith.constant 1.000000e+00 : f32
    %155 = vector.broadcast %cst_66 : f32 to vector<12x32xf32>
    %156 = arith.subf %154, %155 : vector<12x32xf32>
    %157 = arith.select %151, %149, %156 : vector<12x32xi1>, vector<12x32xf32>
    %158 = arith.truncf %157 : vector<12x32xf32> to vector<12x32xbf16>
    %cst_67 = arith.constant dense<0.000000e+00> : vector<12x32xf32>
    %159 = tpu.matmul %20, %158, %cst_67 {dimension_numbers = #tpu.dot_dimension_numbers<[1], [0], [0], [1], [0, 0, 1, 1], [], []>} : vector<12x12xbf16>, vector<12x32xbf16>, vector<12x32xf32> -> vector<12x32xf32>
    %160 = vector.extract_strided_slice %113 {offsets = [0, 32], sizes = [12, 32], strides = [1, 1]} : vector<12x64xf32> to vector<12x32xf32>
    %161 = arith.addf %159, %160 : vector<12x32xf32>
    %c0_68 = arith.constant 0 : index
    %c0_69 = arith.constant 0 : index
    %162 = vector.load %arg17[%c0_68, %c0_69] : memref<32x64xbf16, #tpu.memory_space<vmem>>, vector<32x64xbf16>
    %163 = arith.truncf %161 : vector<12x32xf32> to vector<12x32xbf16>
    %cst_70 = arith.constant dense<0.000000e+00> : vector<12x64xf32>
    %164 = tpu.matmul %163, %162, %cst_70 {dimension_numbers = #tpu.dot_dimension_numbers<[1], [0], [0], [1], [0, 0, 1, 1], [], []>} : vector<12x32xbf16>, vector<32x64xbf16>, vector<12x64xf32> -> vector<12x64xf32>
    %c0_71 = arith.constant 0 : index
    %c0_72 = arith.constant 0 : index
    %165 = vector.load %arg18[%c0_71, %c0_72] : memref<1x64xf32, #tpu.memory_space<vmem>>, vector<1x64xf32>
    %166 = vector.broadcast %165 : vector<1x64xf32> to vector<12x64xf32>
    %167 = arith.addf %164, %166 : vector<12x64xf32>
    %cst_73 = arith.constant 0.000000e+00 : f32
    %168 = vector.broadcast %cst_73 : f32 to vector<12x64xf32>
    %169 = arith.maximumf %167, %168 : vector<12x64xf32>
    %c0_74 = arith.constant 0 : index
    %c0_75 = arith.constant 0 : index
    %170 = vector.load %arg19[%c0_74, %c0_75] : memref<64x32xbf16, #tpu.memory_space<vmem>>, vector<64x32xbf16>
    %171 = arith.truncf %169 : vector<12x64xf32> to vector<12x64xbf16>
    %cst_76 = arith.constant dense<0.000000e+00> : vector<12x32xf32>
    %172 = tpu.matmul %171, %170, %cst_76 {dimension_numbers = #tpu.dot_dimension_numbers<[1], [0], [0], [1], [0, 0, 1, 1], [], []>} : vector<12x64xbf16>, vector<64x32xbf16>, vector<12x32xf32> -> vector<12x32xf32>
    %c0_77 = arith.constant 0 : index
    %c0_78 = arith.constant 0 : index
    %173 = vector.load %arg20[%c0_77, %c0_78] : memref<1x32xf32, #tpu.memory_space<vmem>>, vector<1x32xf32>
    %174 = vector.broadcast %173 : vector<1x32xf32> to vector<12x32xf32>
    %175 = arith.addf %172, %174 : vector<12x32xf32>
    %cst_79 = arith.constant dense<0.000000e+00> : vector<32xf32>
    %176 = vector.multi_reduction <add>, %175, %cst_79 [0] : vector<12x32xf32> to vector<32xf32>
    %177 = vector.shape_cast %176 : vector<32xf32> to vector<1x32xf32>
    %cst_80 = arith.constant 1.200000e+01 : f32
    %178 = vector.broadcast %cst_80 : f32 to vector<1x32xf32>
    %179 = arith.divf %177, %178 : vector<1x32xf32>
    %180 = vector.broadcast %179 : vector<1x32xf32> to vector<12x32xf32>
    %181 = arith.subf %175, %180 : vector<12x32xf32>
    %182 = arith.mulf %181, %181 : vector<12x32xf32>
    %cst_81 = arith.constant dense<0.000000e+00> : vector<32xf32>
    %183 = vector.multi_reduction <add>, %182, %cst_81 [0] : vector<12x32xf32> to vector<32xf32>
    %184 = vector.shape_cast %183 : vector<32xf32> to vector<1x32xf32>
    %cst_82 = arith.constant 1.200000e+01 : f32
    %185 = vector.broadcast %cst_82 : f32 to vector<1x32xf32>
    %186 = arith.divf %184, %185 : vector<1x32xf32>
    %187 = vector.broadcast %179 : vector<1x32xf32> to vector<12x32xf32>
    %188 = arith.subf %175, %187 : vector<12x32xf32>
    %cst_83 = arith.constant 9.99999974E-6 : f32
    %189 = vector.broadcast %cst_83 : f32 to vector<1x32xf32>
    %190 = arith.addf %186, %189 : vector<1x32xf32>
    %191 = math.rsqrt %190 : vector<1x32xf32>
    %192 = vector.broadcast %191 : vector<1x32xf32> to vector<12x32xf32>
    %193 = arith.mulf %188, %192 : vector<12x32xf32>
    %194 = tpu.iota {dimensions = array<i32: 1>} : vector<2x12xi32>
    %c0_84 = arith.constant 0 : index
    %c0_85 = arith.constant 0 : index
    %195 = vector.load %arg2[%c0_84, %c0_85] : memref<2x1xi32, #tpu.memory_space<vmem>>, vector<2x1xi32>
    %196 = vector.broadcast %195 : vector<2x1xi32> to vector<2x12xi32>
    %197 = arith.cmpi eq, %194, %196 : vector<2x12xi32>
    %198 = arith.extui %197 : vector<2x12xi1> to vector<2x12xi32>
    %199 = arith.sitofp %198 : vector<2x12xi32> to vector<2x12xf32>
    %200 = arith.truncf %199 : vector<2x12xf32> to vector<2x12xbf16>
    %201 = arith.truncf %193 : vector<12x32xf32> to vector<12x32xbf16>
    %cst_86 = arith.constant dense<0.000000e+00> : vector<2x32xf32>
    %202 = tpu.matmul %200, %201, %cst_86 {dimension_numbers = #tpu.dot_dimension_numbers<[1], [0], [0], [1], [0, 0, 1, 1], [], []>} : vector<2x12xbf16>, vector<12x32xbf16>, vector<2x32xf32> -> vector<2x32xf32>
    %c0_87 = arith.constant 0 : index
    %c0_88 = arith.constant 0 : index
    %203 = vector.load %arg21[%c0_87, %c0_88] : memref<32x16xbf16, #tpu.memory_space<vmem>>, vector<32x16xbf16>
    %204 = arith.truncf %202 : vector<2x32xf32> to vector<2x32xbf16>
    %cst_89 = arith.constant dense<0.000000e+00> : vector<2x16xf32>
    %205 = tpu.matmul %204, %203, %cst_89 {dimension_numbers = #tpu.dot_dimension_numbers<[1], [0], [0], [1], [0, 0, 1, 1], [], []>} : vector<2x32xbf16>, vector<32x16xbf16>, vector<2x16xf32> -> vector<2x16xf32>
    %c0_90 = arith.constant 0 : index
    %c0_91 = arith.constant 0 : index
    %206 = vector.load %arg22[%c0_90, %c0_91] : memref<1x16xf32, #tpu.memory_space<vmem>>, vector<1x16xf32>
    %207 = vector.broadcast %206 : vector<1x16xf32> to vector<2x16xf32>
    %208 = arith.addf %205, %207 : vector<2x16xf32>
    %cst_92 = arith.constant 0.000000e+00 : f32
    %209 = vector.broadcast %cst_92 : f32 to vector<2x16xf32>
    %210 = arith.cmpf ogt, %208, %209 : vector<2x16xf32>
    %cst_93 = arith.constant 0.000000e+00 : f32
    %211 = vector.broadcast %cst_93 : f32 to vector<2x16xf32>
    %212 = arith.minimumf %208, %211 : vector<2x16xf32>
    %213 = math.exp %212 : vector<2x16xf32>
    %cst_94 = arith.constant 1.000000e+00 : f32
    %214 = vector.broadcast %cst_94 : f32 to vector<2x16xf32>
    %215 = arith.subf %213, %214 : vector<2x16xf32>
    %216 = arith.select %210, %208, %215 : vector<2x16xi1>, vector<2x16xf32>
    %c0_95 = arith.constant 0 : index
    %c0_96 = arith.constant 0 : index
    %217 = vector.load %arg23[%c0_95, %c0_96] : memref<16x3xbf16, #tpu.memory_space<vmem>>, vector<16x3xbf16>
    %218 = arith.truncf %216 : vector<2x16xf32> to vector<2x16xbf16>
    %cst_97 = arith.constant dense<0.000000e+00> : vector<2x3xf32>
    %219 = tpu.matmul %218, %217, %cst_97 {dimension_numbers = #tpu.dot_dimension_numbers<[1], [0], [0], [1], [0, 0, 1, 1], [], []>} : vector<2x16xbf16>, vector<16x3xbf16>, vector<2x3xf32> -> vector<2x3xf32>
    %c0_98 = arith.constant 0 : index
    %c0_99 = arith.constant 0 : index
    %220 = vector.load %arg24[%c0_98, %c0_99] : memref<1x3xf32, #tpu.memory_space<vmem>>, vector<1x3xf32>
    %221 = vector.broadcast %220 : vector<1x3xf32> to vector<2x3xf32>
    %222 = arith.addf %219, %221 : vector<2x3xf32>
    %c0_100 = arith.constant 0 : index
    %c0_101 = arith.constant 0 : index
    %223 = vector.load %arg25[%c0_100, %c0_101] : memref<2x3xf32, #tpu.memory_space<vmem>>, vector<2x3xf32>
    tpu.vector_store %arg25[%c0_100, %c0_101], %222 {strides = array<i32>} : memref<2x3xf32, #tpu.memory_space<vmem>>, vector<2x3xf32>,
    return
  }
}

</mosaic_0001>

<bundles_post_ra>
// kernel: graph_model_forward.1
= control target key start
LH: loop header
LB: loop body
LE: loop exit
PB: predicated region body
PF: predicated region fallthrough
CT: control target
= control target key end

     0   :  { %s3990_s0 = inlined_call_operand.vmem [shape: s32[1,24], index: 0, kind: input, shape index: {}]   ;;  %s3991_s1 = inlined_call_operand.vmem [shape: s32[1,24], index: 1, kind: input, shape index: {}]   ;;  %s3992_s2 = inlined_call_operand.vmem [shape: s32[2,1], index: 2, kind: input, shape index: {}]   ;;  %s3993_s3 = inlined_call_operand.vmem [shape: f32[12,7], index: 3, kind: input, shape index: {}]   ;;  %s3994_s4 = inlined_call_operand.vmem [shape: f32[24,5], index: 4, kind: input, shape index: {}]   ;;  %s3995_s5 = inlined_call_operand.vmem [shape: f32[1,448], index: 5, kind: input, shape index: {}]   ;;  %s3996_s6 = inlined_call_operand.vmem [shape: f32[1,448], index: 6, kind: input, shape index: {}]   ;;  %s3997_s7 = inlined_call_operand.vmem [shape: bf16[448,32], index: 7, kind: input, shape index: {}]   ;;  %s3998_s8 = inlined_call_operand.vmem [shape: f32[1,32], index: 8, kind: input, shape index: {}]   ;;  %s3999_s9 = inlined_call_operand.vmem [shape: f32[1,640], index: 9, kind: input, shape index: {}]   ;;  %s4000_s10 = inlined_call_operand.vmem [shape: f32[1,640], index: 10, kind: input, shape index: {}]   ;;  %s4001_s11 = inlined_call_operand.vmem [shape: bf16[640,64], index: 11, kind: input, shape index: {}]   ;;  %s4002_s12 = inlined_call_operand.vmem [shape: f32[1,64], index: 12, kind: input, shape index: {}]   ;;  %s4003_s13 = inlined_call_operand.vmem [shape: bf16[32,64], index: 13, kind: input, shape index: {}]   ;;  %s4004_s14 = inlined_call_operand.vmem [shape: f32[1,64], index: 14, kind: input, shape index: {}]   ;;  %s4005_s15 = inlined_call_operand.vmem [shape: bf16[64,32], index: 15, kind: input, shape index: {}]   ;;  %s4006_s16 = inlined_call_operand.vmem [shape: f32[1,32], index: 16, kind: input, shape index: {}]   ;;  %s4007_s17 = inlined_call_operand.vmem [shape: bf16[32,64], index: 17, kind: input, shape index: {}]   ;;  %s4008_s18 = inlined_call_operand.vmem [shape: f32[1,64], index: 18, kind: input, shape index: {}]   ;;  %s4009_s19 = inlined_call_operand.vmem [shape: bf16[64,32], index: 19, kind: input, shape index: {}]   ;;  %s4010_s20 = inlined_call_operand.vmem [shape: f32[1,32], index: 20, kind: input, shape index: {}]   ;;  %s4011_s21 = inlined_call_operand.vmem [shape: bf16[32,16], index: 21, kind: input, shape index: {}]   ;;  %s4012_s22 = inlined_call_operand.vmem [shape: f32[1,16], index: 22, kind: input, shape index: {}]   ;;  %s4013_s23 = inlined_call_operand.vmem [shape: bf16[16,3], index: 23, kind: input, shape index: {}]   ;;  %s4014_s24 = inlined_call_operand.vmem [shape: f32[1,3], index: 24, kind: input, shape index: {}]   ;;  %s4015_s25 = inlined_call_operand.hbm [shape: f32[2,3], index: 25, kind: output, shape index: {}]  }
   0x1   :  { %4030 = sst [smem:[#allocation14_spill]] %s3990_s0 }
   0x2   :  { %4031 = sst [smem:[#allocation15_spill]] %s3991_s1 }
   0x3   :  { %4032 = sst [smem:[#allocation16_spill]] %s3992_s2 }
   0x4   :  { %4033 = sst [smem:[#allocation17_spill]] %s3993_s3 }
   0x5   :  { %4034 = sst [smem:[#allocation18_spill]] %s3994_s4 }
   0x6   :  { %4035 = sst [smem:[#allocation19_spill]] %s3995_s5 }
   0x7   :  { %4036 = sst [smem:[#allocation20_spill]] %s3996_s6 }
   0x8   :  { %4037 = sst [smem:[#allocation21_spill]] %s3997_s7 }
   0x9   :  { %4038 = sst [smem:[#allocation22_spill]] %s3998_s8 }
   0xa   :  { %4039 = sst [smem:[#allocation23_spill]] %s3999_s9 }
   0xb   :  { %v82_v0 = vlaneseq  ;;  %vm202_vm0 = vcmask 1042432   ;;  %vm203_vm1 = vcmask 1043456   ;;  %vm746_vm2 = vcmask 1041408   ;;  %s4040_s6 = sld [smem:[#allocation14_spill]]  ;;  %s4042_s3 = sld [smem:[#allocation15_spill]] }
   0xc   :  { %v4019_v1 = vmov 0.0   ;;  %v2945_v5 = vmov 65535   ;;  %v2946_v8 = vmov 0   ;;  %vm2947_vm5 = vmmov 0   ;;  %s4047_s8 = sld [smem:[#allocation17_spill]]  ;;  %s4048_s28 = sld [smem:[#allocation21_spill]] }
   0xd   :  { %2687 = vmatprep.subr.bf16.mxu0 %v4019_v1  ;;  %v3084_v3 = vshrl.u32 %v82_v0, 7  ;;  %v3086_v4 = vand.u32 127, %v82_v0  ;;  %v204_v6 = vsel %vm202_vm0, 4294967295, %v2945_v5  ;;  %v747_v7 = vsel %vm746_vm2, 4294967295, %v2945_v5  ;;  %250 = vmatprep.mubr.bf16.mxu1 %v2946_v8 }
   0xe   :  { %2825 = vset.pattern.permute.xlu1 %v2946_v8  ;;  %v3090_v9 = vsel %vm202_vm0, %v747_v7, 0  ;;  %2826 = vset.pattern.permute.xlu0 %v2946_v8  ;;  %v205_v12 = vsel %vm203_vm1, %v204_v6, 0  ;;  %vm117_vm12 = vcmask 195584  }
   0xf   :  { %4041 = vst [vmem:[#allocation5_spill] sm:$0xff] %v3086_v4  ;;  %v3094_v10 = vmul.u32 64, %v3084_v3  ;;  %v167_v11 = vadd.s32 128, %v3086_v4  ;;  %v3099_v13 = vadd.s32 384, %v3086_v4  ;;  %v3102_v14 = vadd.s32 8, %v3084_v3  ;;  %2689 = vmatprep.mubr.msk.bf16.mxu0 %vm2947_vm5, %v4019_v1 }
  0x10   :  { %v3120_v18 = vadd.s32 256, %v3086_v4 }
  0x11   :  { %v2383_v2 = vld [vmem:[%s4040_s6] ss:$0 sm:$0xff]  ;;  %vm171_vm4 = vcmp.ge.s32.totalorder %v167_v11, %v3094_v10  ;;  %v3107_v15 = vadd.s32 64, %v3094_v10  ;;  %v3110_v16 = vadd.s32 320, %v3094_v10  ;;  %vm170_vm6 = vcmp.ge.s32.totalorder %v3086_v4, %v3094_v10 }
  0x12   :  { %vm102_vm3 = vcmp.eq.s32.totalorder %v3084_v3, %v2383_v2  ;;  %v2380_v17 = vld [vmem:[%s4042_s3] ss:$0 sm:$0xff]  ;;  %vm103_vm7 = vcmp.eq.s32.totalorder %v3102_v14, %v2383_v2  ;;  %vm173_vm15 = vcmp.ge.s32.totalorder %v3099_v13, %v3094_v10  ;;  %v196_v32 = vld [vmem:[%s4047_s8 + $0x8] sm:$0xf]  ;;  %v2835_v52 = vld [vmem:[%s4048_s28 + $0x50] sm:$0xff]  }
  0x13   :  { %v2384_v19 = vsel %vm102_vm3, 1.0, %v4019_v1  ;;  %vm176_vm8 = vcmp.lt.s32.totalorder %v167_v11, %v3107_v15  ;;  %vm699_vm9 = vcmp.ge.s32.totalorder %v167_v11, %v3110_v16  ;;  %v3127_v20 = vadd.s32 64, %v3110_v16  ;;  %v195_v25 = vld [vmem:[%s4047_s8] sm:$0xff]  ;;  %v2832_v47 = vld [vmem:[%s4048_s28 + $0x48] sm:$0xff]   ;;  %v2836_v53 = vld [vmem:[%s4048_s28 + $0x10] sm:$0xff]  }
  0x14   :  { %vm175_vm10 = vcmp.lt.s32.totalorder %v3086_v4, %v3107_v15  ;;  %vm3131_vm11 = vmand %vm171_vm4, %vm176_vm8  ;;  %v2385_v22 = vsel %vm103_vm7, 1.0, %v4019_v1  ;;  %v2829_v27 = vld [vmem:[%s4048_s28 + $0x40] sm:$0xff]   ;;  %vm90_vm2 = vcmp.eq.s32.totalorder %v3084_v3, %v2380_v17  ;;  %vm91_vm3 = vcmp.eq.s32.totalorder %v3102_v14, %v2380_v17  ;;  %v2833_v50 = vld [vmem:[%s4048_s28 + $0x8] sm:$0xff]  }
  0x15   :  { %v2390_v23 = vsel %vm3131_vm11, 1.0, %v4019_v1  ;;  %vm705_vm13 = vcmp.lt.s32.totalorder %v167_v11, %v3127_v20  ;;  %vm3140_vm14 = vmand %vm170_vm6, %vm175_vm10  ;;  %v108_v26 = vpack.c.bf16 %v2385_v22, %v2384_v19  ;;  %vm178_vm6 = vcmp.lt.s32.totalorder %v3099_v13, %v3107_v15  ;;  %v2830_v45 = vld [vmem:[%s4048_s28] sm:$0xff]   ;;  %v2838_v54 = vld [vmem:[%s4048_s28 + $0x58] sm:$0xff]  }
  0x16   :  { %v192_v28 = vpack.c.bf16 %v2390_v23, %v2390_v23  ;;  %vm3152_vm0 = vmand %vm699_vm9, %vm705_vm13  ;;  %v2389_v30 = vsel %vm3140_vm14, 1.0, %v4019_v1  ;;  %vm172_vm7 = vcmp.ge.s32.totalorder %v3120_v18, %v3094_v10  ;;  %vm177_vm8 = vcmp.lt.s32.totalorder %v3120_v18, %v3107_v15  ;;  %v2827_v51 = vld [vmem:[%s4048_s28 + $0x80] sm:$0xff]   ;;  %v2828_v55 = vld [vmem:[%s4048_s28 + $0x88] sm:$0xff]  }
  0x17   :  { %vm715_vm4 = vmor %vm3131_vm11, %vm3152_vm0  ;;  %v191_v31 = vpack.c.bf16 %v2389_v30, %v2389_v30  ;;  %v122_v33 = vsel %vm117_vm12, %v108_v26, 0  ;;  %v2381_v35 = vsel %vm90_vm2, 1.0, %v4019_v1  ;;  %v2382_v36 = vsel %vm91_vm3, 1.0, %v4019_v1  ;;  %v2839_v56 = vld [vmem:[%s4048_s28 + $0x18] sm:$0xff]   ;;  %v2841_v57 = vld [vmem:[%s4048_s28 + $0x60] sm:$0xff]  }
  0x18   :  { %v210_v34 = vand.u32 %v205_v12, %v192_v28  ;;  %2688 = vmatpush3.bf16.xpose.msra.mxu0 %v122_v33  ;;  %v197_v38 = vpack.c.bf16 %v196_v32, %v195_v25  ;;  %vm3180_vm9 = vmand %vm173_vm15, %vm178_vm6  ;;  %vm198_vm10 = vcmask 56320   ;;  %v3194_v42 = vpack.c.bf16 %v2382_v36, %v2381_v35  ;;  %v2831_v58 = vld [vmem:[%s4048_s28 + $0x90] sm:$0xff]   ;;  %v2842_v59 = vld [vmem:[%s4048_s28 + $0x20] sm:$0xff]  }
  0x19   :  { %v207_v37 = vand.u32 %v205_v12, %v191_v31  ;;  %2513 = vmatprep.subr.bf16.mxu0 %v2829_v27  ;;  %v2392_v40 = vsel %vm3180_vm9, 1.0, %v4019_v1  ;;  %vm3190_vm13 = vmand %vm172_vm7, %vm177_vm8  ;;  %v2834_v60 = vld [vmem:[%s4048_s28 + $0x98] sm:$0xff]   ;;  %v2837_v61 = vld [vmem:[%s4048_s28 + $0xa0] sm:$0xff]  }
  0x1a   :  { %218 = vmatprep.subr.bf16.mxu1 %v210_v34  ;;  %4055 = vst [vmem:[#allocation6_spill] sm:$0xff] %v3194_v42  ;;  %v194_v43 = vpack.c.bf16 %v2392_v40, %v2392_v40  ;;  %v2391_v44 = vsel %vm3190_vm13, 1.0, %v4019_v1  ;;  %v2840_v62 = vld [vmem:[%s4048_s28 + $0xa8] sm:$0xff]   ;;  %v2843_v63 = vld [vmem:[%s4048_s28 + $0xb0] sm:$0xff]  }
  0x1b   :  { %219 = vmatpush1.bf16.msra.mxu1 %v207_v37  ;;  %v193_v46 = vpack.c.bf16 %v2391_v44, %v2391_v44 }
  0x1c   :  { %v216_v48 = vand.u32 %v205_v12, %v194_v43 }
  0x1d   :  { %v213_v49 = vand.u32 %v205_v12, %v193_v46 }
  0x1e   :  { %2393 = vmatmul.mubr.msk.bf16.vlgmr.msra.gmra.mrb[0].mxu1 %vm198_vm10, %v197_v38  ;;  %261 = vmatprep.subr.bf16.mxu1 %v216_v48 }
  0x1f   :  { %293 = vmatprep.mubr.bf16.mxu1 %v2946_v8  ;;  %2690 = vmatmul.mubr.msk.bf16.vlgmr.msra.gmra.mrb[0].mxu0 %vm117_vm12, %v3194_v42 }
  0x20   :  { %2514 = vmatpush3.bf16.msra.mxu0 %v2830_v45  ;;  %262 = vmatpush1.bf16.msra.mxu1 %v213_v49 }
  0x21   :  { %2515 = vmatprep.subr.bf16.mxu0 %v2832_v47  ;;  %652 = vmatprep.subr.bf16.mxu1 %v2946_v8 }
  0x24   :  { %2516 = vmatpush3.bf16.msra.mxu0 %v2833_v50 }
  0x25   :  { %2517 = vmatprep.subr.bf16.mxu0 %v2835_v52 }
  0x26   :  { %2394 = vmatmul.mubr.msk.bf16.vlgmr.msra.gmra.mrb[4].mxu1 %vm198_vm10, %v197_v38 }
  0x27   :  { %653 = vmatpush1.bf16.msra.mxu1 %v2827_v51 }
  0x28   :  { %654 = vmatprep.subr.bf16.mxu1 %v2946_v8  ;;  %2518 = vmatpush3.bf16.msra.mxu0 %v2836_v53 }
  0x29   :  { %2519 = vmatprep.subr.bf16.mxu0 %v2838_v54 }
  0x2b   :  { %655 = vmatpush1.bf16.msra.mxu1 %v2828_v55 }
  0x2c   :  { %656 = vmatprep.subr.bf16.mxu1 %v2946_v8  ;;  %2520 = vmatpush3.bf16.msra.mxu0 %v2839_v56 }
  0x2d   :  { %2521 = vmatprep.subr.bf16.mxu0 %v2841_v57 }
  0x2f   :  { %657 = vmatpush1.bf16.msra.mxu1 %v2831_v58 }
  0x30   :  { %658 = vmatprep.subr.bf16.mxu1 %v2946_v8  ;;  %2522 = vmatpush3.bf16.msra.mxu0 %v2842_v59 }
  0x33   :  { %659 = vmatpush1.bf16.msra.mxu1 %v2834_v60 }
  0x34   :  { %660 = vmatprep.subr.bf16.mxu1 %v2946_v8 }
  0x37   :  { %661 = vmatpush1.bf16.msra.mxu1 %v2837_v61 }
  0x38   :  { %662 = vmatprep.subr.bf16.mxu1 %v2946_v8 }
  0x3b   :  { %663 = vmatpush1.bf16.msra.mxu1 %v2840_v62 }
  0x3c   :  { %664 = vmatprep.subr.bf16.mxu1 %v2946_v8 }
  0x3f   :  { %665 = vmatpush1.bf16.msra.mxu1 %v2843_v63 }
  0x40   :  { %666 = vmatprep.subr.bf16.mxu1 %v2946_v8 }
  0x41   :  { %30 = vsyncpa [#allocation3], 0  ;;  %v2844_v0 = vld [vmem:[%s4048_s28 + $0x68] sm:$0xff]   ;;  %vm698_vm15 = vcmp.ge.s32.totalorder %v3086_v4, %v3110_v16  ;;  %vm704_vm2 = vcmp.lt.s32.totalorder %v3086_v4, %v3127_v20  ;;  %v2846_v5 = vld [vmem:[%s4048_s28 + $0xb8] sm:$0xff]   ;;  %v3304_v23 = vsel %vm715_vm4, 1.0, %v4019_v1  ;;  %v693_v29 = vadd.s32 512, %v3086_v4 }
  0x42   :  { %v2845_v2 = vld [vmem:[%s4048_s28 + $0x28] sm:$0xff]   ;;  %2523 = vmatprep.subr.bf16.mxu0 %v2844_v0  ;;  %vm709_vm3 = vmand %vm698_vm15, %vm704_vm2  ;;  %v2847_v6 = vld [vmem:[%s4048_s28 + $0x70] sm:$0xff]   ;;  %v730_v26 = vpack.c.bf16 %v3304_v23, %v3304_v23  ;;  %s4057_s5 = sld [smem:[#allocation19_spill]]  ;;  %v3343_v33 = vsub.s32 1, %v3084_v3  ;;  %vm701_vm15 = vcmp.ge.s32.totalorder %v3099_v13, %v3110_v16  ;;  %vm707_vm2 = vcmp.lt.s32.totalorder %v3099_v13, %v3127_v20  ;;  %s4058_s2 = sld [smem:[#allocation20_spill]] }
  0x43   :  { %2524 = vmatpush3.bf16.msra.mxu0 %v2845_v2  ;;  %667 = vmatpush1.bf16.msra.mxu1 %v2846_v5  ;;  %v2848_v7 = vld [vmem:[%s4048_s28 + $0x30] sm:$0xff]   ;;  %v2849_v11 = vld [vmem:[%s4048_s28 + $0xc0] sm:$0xff]   ;;  %vm714_vm6 = vmor %vm3140_vm14, %vm709_vm3  ;;  %vm694_vm11 = vcmp.ge.s32.totalorder %v693_v29, %v3094_v10  ;;  %vm695_vm14 = vcmp.lt.s32.totalorder %v693_v29, %v3107_v15  ;;  %vm702_vm0 = vcmp.ge.s32.totalorder %v693_v29, %v3110_v16  ;;  %v3337_v10 = vsub.s32 0, %v3084_v3  ;;  %s4066_s7 = sld [smem:[#allocation18_spill]]  ;;  %s4068_s6 = sld [smem:[#allocation23_spill]] }
  0x44   :  { %668 = vmatprep.subr.bf16.mxu1 %v2946_v8  ;;  %2525 = vmatprep.subr.bf16.mxu0 %v2847_v6  ;;  %v2850_v12 = vld [vmem:[%s4048_s28 + $0x78] sm:$0xff]   ;;  %v2852_v19 = vld [vmem:[%s4048_s28 + $0xc8] sm:$0xff]   ;;  %v3296_v22 = vsel %vm714_vm6, 1.0, %v4019_v1  ;;  %v2853_v25 = vld [vmem:[%s4048_s28 + $0xd0] sm:$0xff]   ;;  %v753_v21 = vand.u32 %v3090_v9, %v730_v26  ;;  %vm708_vm4 = vcmp.lt.s32.totalorder %v693_v29, %v3127_v20  ;;  %vm111_vm3 = vcmp.eq.s32.totalorder %v3084_v3, %v3086_v4  ;;  %s4070_s1 = sld [smem:[#allocation22_spill]] }
  0x45   :  { %v2851_v17 = vld [vmem:[%s4048_s28 + $0x38] sm:$0xff]   ;;  %v729_v24 = vpack.c.bf16 %v3296_v22, %v3296_v22  ;;  %vm696_vm7 = vmand %vm694_vm11, %vm695_vm14  ;;  %4056 = vst [vmem:[#allocation7_spill] sm:$0xff] %v3337_v10  ;;  %vm112_vm11 = vcmp.eq.s32.totalorder %v3102_v14, %v3086_v4  ;;  %v2386_v38 = vsel %vm111_vm3, 1.0, %v4019_v1  ;;  %v3366_v46 = vsub.s32 2, %v3084_v3 }
  0x46   :  { %v2854_v27 = vld [vmem:[%s4048_s28 + $0xd8] sm:$0xff]   ;;  %vm713_vm8 = vmand %vm702_vm0, %vm708_vm4  ;;  %v3369_v47 = vsub.s32 3, %v3084_v3  ;;  %v2387_v48 = vsel %vm112_vm11, 1.0, %v4019_v1  ;;  %vm700_vm0 = vcmp.ge.s32.totalorder %v3120_v18, %v3110_v16  ;;  %vm706_vm4 = vcmp.lt.s32.totalorder %v3120_v18, %v3127_v20  ;;  %v3506_v20 = vld [vmem:[%s4001_s11 + $0x68] sm:$0xff]  }
  0x47   :  { %2526 = vmatpush3.bf16.msra.mxu0 %v2848_v7  ;;  %669 = vmatpush1.bf16.msra.mxu1 %v2849_v11  ;;  %v3320_v28 = vand.u32 %v3090_v9, %v729_v24  ;;  %vm718_vm10 = vmor %vm696_vm7, %vm713_vm8  ;;  %vm739_vm8 = vcmask 39936   ;;  %vm2320_vm11 = vcmask 130048  }
  0x48   :  { %670 = vmatprep.subr.bf16.mxu1 %v2946_v8  ;;  %2527 = vmatprep.subr.bf16.mxu0 %v2850_v12  ;;  %v3328_v30 = vsel %vm718_vm10, 1.0, %v4019_v1  ;;  %v304_v15 = vld [vmem:[%s4057_s5] sm:$0xf]  ;;  %vm3356_vm6 = vmand %vm701_vm15, %vm707_vm2  ;;  %vm1699_vm10 = vcmask 1045504   ;;  %vm1695_vm15 = vcmask 97280  }
  0x49   :  { %v733_v31 = vpack.c.bf16 %v3328_v30, %v3328_v30  ;;  %v334_v34 = vld [vmem:[%s4058_s2] sm:$0xf]  ;;  %v309_v35 = vrot.slane %v304_v15, %v3337_v10  ;;  %v313_v36 = vrot.slane %v304_v15, %v3343_v33  ;;  %vm717_vm14 = vmor %vm3180_vm9, %vm3356_vm6  ;;  %v317_v62 = vrot.slane %v304_v15, %v3366_v46 }
  0x4a   :  { %v339_v13 = vrot.slane %v334_v34, %v3337_v10  ;;  %v343_v43 = vrot.slane %v334_v34, %v3343_v33  ;;  %v3381_v58 = vsel %vm717_vm14, 1.0, %v4019_v1  ;;  %vm3387_vm9 = vmand %vm700_vm0, %vm706_vm4  ;;  %v321_v0 = vrot.slane %v304_v15, %v3369_v47 }
  0x4b   :  { %2528 = vmatpush3.bf16.msra.mxu0 %v2851_v17  ;;  %671 = vmatpush1.bf16.msra.mxu1 %v2852_v19  ;;  %v3333_v32 = vand.u32 %v3090_v9, %v733_v31  ;;  %4061 = vst [vmem:[#allocation8_spill] sm:$0xff] %v3381_v58  ;;  %v347_v7 = vrot.slane %v334_v34, %v3366_v46  ;;  %vm716_vm7 = vmor %vm3190_vm13, %vm3387_vm9  ;;  %vm607_vm13 = vcmask 523264   ;;  %vm2364_vm14 = vcmask 17408  }
  0x4c   :  { %672 = vmatprep.subr.bf16.mxu1 %v2946_v8  ;;  %764 = vmatprep.subr.bf16.mxu0 %v753_v21  ;;  %v732_v11 = vpack.c.bf16 %v3381_v58, %v3381_v58  ;;  %v351_v16 = vrot.slane %v334_v34, %v3369_v47 }
  0x4f   :  { %673 = vmatpush1.bf16.msra.mxu1 %v2853_v25 }
  0x50   :  { %674 = vmatprep.subr.bf16.mxu1 %v2946_v8 }
  0x53   :  { %675 = vmatpush1.bf16.msra.mxu1 %v2854_v27 }
  0x54   :  { %2693 = vmatprep.subr.bf16.mxu1 %v3333_v32 }
  0xf1   :  { %v252_v40 = vpop.f32.mrb[0].mxu1 }
  0xf2   :  { %v326_v44 = vmul.f32 %v309_v35, %v252_v40  ;;  %v254_v45 = vpop.f32.mrb[1].mxu1  ;;  %v158_v14 = vpop.f32.mrb[0].mxu0 }
  0xf3   :  { %v327_v49 = vmul.f32 %v313_v36, %v254_v45  ;;  %v256_v50 = vpop.f32.mrb[2].mxu1  ;;  %v159_v51 = vadd.f32 %v2386_v38, %v158_v14  ;;  %v2691_v52 = vpop.f32.mrb[1].mxu0 }
  0xf4   :  { %v356_v53 = vadd.f32 %v339_v13, %v326_v44  ;;  %v330_v54 = vmul.f32 %v309_v35, %v256_v50  ;;  %v258_v55 = vpop.f32.mrb[3].mxu1  ;;  %v161_v56 = vpop.f32.mrb[2].mxu0  ;;  %v759_v35 = vand.u32 %v3090_v9, %v732_v11  ;;  %v735_v44 = vld [vmem:[%s4066_s7 + $0x8] sm:$0xff]  ;;  %v3421_v52 = vld [vmem:[%s4001_s11 + $0x40] sm:$0xff]   ;;  %v3540_v11 = vld [vmem:[%s4001_s11 + $0x30] sm:$0xff]  }
  0xf5   :  { %v357_v57 = vadd.f32 %v343_v43, %v327_v49  ;;  %v331_v39 = vmul.f32 %v313_v36, %v258_v55  ;;  %v162_v59 = vadd.f32 %v2387_v48, %v161_v56  ;;  %v2692_v60 = vpop.f32.mrb[3].mxu0  ;;  %v3404_v36 = vsel %vm716_vm7, 1.0, %v4019_v1  ;;  %v3450_v55 = vld [vmem:[%s4001_s11 + $0x8] sm:$0xff]   ;;  %v3456_v56 = vld [vmem:[%s4001_s11 + $0x50] sm:$0xff]  }
  0xf6   :  { %v360_v61 = vadd.f32 %v339_v13, %v330_v54  ;;  %v364_v5 = vmax.f32 %v356_v53, 0.0  ;;  %4065 = vst [vmem:[#allocation10_spill] sm:$0xff] %v3404_v36  ;;  %v731_v45 = vpack.c.bf16 %v3404_v36, %v3404_v36  ;;  %v736_v53 = vld [vmem:[%s4066_s7 + $0x10] sm:$0xff]  ;;  %v3437_v54 = vld [vmem:[%s4001_s11] sm:$0xff]  }
  0xf7   :  { %v361_v63 = vadd.f32 %v343_v43, %v331_v39  ;;  %v3392_v2 = vpack.c.bf16 %v162_v59, %v159_v51  ;;  %v365_v12 = vmax.f32 %v357_v57, 0.0  ;;  %v734_v43 = vld [vmem:[%s4066_s7] sm:$0xff]  ;;  %v3470_v57 = vld [vmem:[%s4001_s11 + $0x58] sm:$0xff]  }
  0xf8   :  { %v368_v6 = vmax.f32 %v360_v61, 0.0  ;;  %v737_v50 = vpack.c.bf16 %v735_v44, %v734_v43  ;;  %v756_v51 = vand.u32 %v3090_v9, %v731_v45  ;;  %v738_v9 = vpack.c.bf16 %v736_v53, %v736_v53  ;;  %v3475_v39 = vld [vmem:[%s4001_s11 + $0x18] sm:$0xff]   ;;  %v3482_v59 = vld [vmem:[%s4001_s11 + $0x60] sm:$0xff]  }
  0xf9   :  { %4064 = vst [vmem:[#allocation9_spill] sm:$0xff] %v3392_v2  ;;  %v369_v17 = vmax.f32 %v361_v63, 0.0  ;;  %v295_v19 = vpop.f32.mrb[4].mxu1  ;;  %v3487_v60 = vld [vmem:[%s4001_s11 + $0xc0] sm:$0xff]   ;;  %v3511_v63 = vld [vmem:[%s4001_s11 + $0xc8] sm:$0xff]  }
  0xfa   :  { %v428_v18 = vpack.c.bf16 %v368_v6, %v364_v5  ;;  %v328_v24 = vmul.f32 %v317_v62, %v295_v19  ;;  %v297_v25 = vpop.f32.mrb[5].mxu1  ;;  %v3492_v61 = vld [vmem:[%s4001_s11 + $0x20] sm:$0xff]   ;;  %v3521_v5 = vld [vmem:[%s4001_s11 + $0x88] sm:$0xff]   ;;  %v3530_v6 = vld [vmem:[%s4001_s11 + $0x70] sm:$0xff]  }
  0xfb   :  { %v329_v26 = vmul.f32 %v321_v0, %v297_v25  ;;  %v299_v21 = vpop.f32.mrb[6].mxu1  ;;  %v429_v27 = vpack.c.bf16 %v369_v17, %v365_v12  ;;  %v3545_v12 = vld [vmem:[%s4001_s11 + $0x90] sm:$0xff]   ;;  %v3554_v17 = vld [vmem:[%s4001_s11 + $0x78] sm:$0xff]   ;;  %v3583_v25 = vld [vmem:[%s4001_s11 + $0x100] sm:$0xff]  }
  0xfc   :  { %v358_v29 = vadd.f32 %v347_v7, %v328_v24  ;;  %v332_v31 = vmul.f32 %v317_v62, %v299_v21  ;;  %v301_v15 = vpop.f32.mrb[7].mxu1  ;;  %v3497_v62 = vld [vmem:[%s4001_s11 + $0x80] sm:$0xff]   ;;  %v3559_v19 = vld [vmem:[%s4001_s11 + $0xd8] sm:$0xff]   ;;  %v3596_v21 = vld [vmem:[%s4001_s11 + $0xe8] sm:$0xff]  }
  0xfd   :  { %v359_v34 = vadd.f32 %v351_v16, %v329_v26  ;;  %v333_v37 = vmul.f32 %v321_v0, %v301_v15  ;;  %643 = vmatprep.mubr.bf16.mxu0 %v429_v27  ;;  %v3516_v0 = vld [vmem:[%s4001_s11 + $0x28] sm:$0xff]   ;;  %v3578_v24 = vld [vmem:[%s4001_s11 + $0xe0] sm:$0xff]   ;;  %v3620_v15 = vld [vmem:[%s4001_s11 + $0xf8] sm:$0xff]  }
  0xfe   :  { %v366_v13 = vmax.f32 %v358_v29, 0.0  ;;  %v362_v41 = vadd.f32 %v347_v7, %v332_v31  ;;  %644 = vmatmul.mubr.bf16.vlgmr.msra.gmra.mrb[4].mxu0 %v428_v18  ;;  %v3535_v7 = vld [vmem:[%s4001_s11 + $0xd0] sm:$0xff]   ;;  %v3569_v18 = vld [vmem:[%s4001_s11 + $0x98] sm:$0xff]   ;;  %v3588_v26 = vld [vmem:[%s4001_s11 + $0xa0] sm:$0xff]  }
  0xff   :  { %v367_v38 = vmax.f32 %v359_v34, 0.0  ;;  %v363_v40 = vadd.f32 %v351_v16, %v333_v37  ;;  %765 = vmatpush1.bf16.msra.mxu0 %v3320_v28  ;;  %796 = vmatprep.mubr.bf16.mxu0 %v2946_v8  ;;  %v3564_v16 = vld [vmem:[%s4001_s11 + $0x38] sm:$0xff]   ;;  %v3601_v27 = vld [vmem:[%s4001_s11 + $0xa8] sm:$0xff]   ;;  %v3608_v29 = vld [vmem:[%s4001_s11 + $0xf0] sm:$0xff]   ;;  %v944_v34 = vsub.s32 4, %v3084_v3  ;;  %v923_v37 = vmul.f32 8.0, %v3328_v30 }
 0x100   :  { %v370_v14 = vmax.f32 %v362_v41, 0.0  ;;  %815 = vmatprep.subr.bf16.mxu0 %v759_v35  ;;  %v3613_v31 = vld [vmem:[%s4001_s11 + $0xb0] sm:$0xff]   ;;  %v3625_v35 = vld [vmem:[%s4001_s11 + $0xb8] sm:$0xff]  }
 0x101   :  { %v371_v48 = vmax.f32 %v363_v40, 0.0  ;;  %4067 = vst [vmem:[#allocation11_spill] sm:$0xff] %v3625_v35 }
 0x102   :  { %v430_v49 = vpack.c.bf16 %v370_v14, %v366_v13  ;;  %v3635_v13 = vld [vmem:[%s4068_s6] sm:$0x1f] }
 0x103   :  { %v431_v28 = vpack.c.bf16 %v371_v48, %v367_v38  ;;  %v3638_v41 = vrot.slane %v3635_v13, %v944_v34  ;;  %v3643_v38 = vld [vmem:[%s4000_s10] sm:$0x1f] }
 0x104   :  { %v3646_v40 = vrot.slane %v3643_v38, %v944_v34  ;;  %v3665_v53 = vrot.slane %v3643_v38, %v3337_v10 }
 0x105   :  { %2424 = vmatprep.mubr.msk.bf16.mxu1 %vm607_vm13, %v431_v28  ;;  %v1027_v3 = vmul.f32 %v3638_v41, %v923_v37  ;;  %v3657_v28 = vrot.slane %v3635_v13, %v3337_v10  ;;  %v3669_v37 = vrot.slane %v3643_v38, %v3343_v33 }
 0x106   :  { %685 = vmatmul.mubr.bf16.vlgmr.msra.gmra.mrb[8].mxu1 %v430_v49  ;;  %2430 = vmatmul.mubr.msk.bf16.vlgmr.msra.gmra.mrb[8].mxu0 %vm739_vm8, %v737_v50 }
 0x107   :  { %806 = vmatprep.mubr.bf16.mxu0 %v2946_v8  ;;  %816 = vmatpush1.bf16.msra.mxu0 %v756_v51  ;;  %v3650_v30 = vadd.f32 %v1027_v3, %v3646_v40  ;;  %v3661_v51 = vrot.slane %v3635_v13, %v3343_v33 }
 0x108   :  { %2694 = vmatpush3.bf16.msra.mxu1 %v3333_v32  ;;  %2695 = vmatprep.mubr.msk.bf16.mxu1 %vm739_vm8, %v737_v50  ;;  %v3442_v32 = vld [vmem:[%s4001_s11 + $0x48] sm:$0xff]  }
 0x109   :  { %2538 = vmatprep.subr.bf16.mxu0 %v3421_v52  ;;  %2566 = vmatprep.subr.bf16.mxu1 %v3487_v60  ;;  %4069 = vst [vmem:[#allocation12_spill] sm:$0xff] %v3650_v30 }
 0x10e   :  { %2431 = vmatmul.mubr.msk.bf16.gmra.mrb[12].mxu0 %vm739_vm8, %v738_v9  ;;  %2696 = vmatmul.mubr.msk.bf16.vlgmr.msra.gmra.mrb[12].mxu1 %vm739_vm8, %v738_v9 }
 0x10f   :  { %847 = vmatprep.mubr.bf16.mxu0 %v2946_v8  ;;  %2567 = vmatpush3.bf16.msra.mxu1 %v3497_v62 }
 0x110   :  { %2568 = vmatprep.subr.bf16.mxu1 %v3511_v63 }
 0x113   :  { %2569 = vmatpush3.bf16.msra.mxu1 %v3521_v5 }
 0x114   :  { %2570 = vmatprep.subr.bf16.mxu1 %v3535_v7 }
 0x116   :  { %2432 = vmatmul.mubr.msk.bf16.vlgmr.msra.gmra.mrb[16].mxu0 %vm739_vm8, %v737_v50  ;;  %v2395_v50 = vld [vmem:[%s4070_s1] ss:$0 sm:$0xff] }
 0x117   :  { %857 = vmatprep.mubr.bf16.mxu0 %v2946_v8  ;;  %2539 = vmatpush3.bf16.msra.mxu0 %v3437_v54  ;;  %v3462_v8 = vld [vmem:[%s4001_s11 + $0x10] sm:$0xff]  }
 0x118   :  { %2540 = vmatprep.subr.bf16.mxu0 %v3442_v32  ;;  %2571 = vmatpush3.bf16.msra.mxu1 %v3545_v12 }
 0x119   :  { %2572 = vmatprep.subr.bf16.mxu1 %v3559_v19 }
 0x11b   :  { %2541 = vmatpush3.bf16.msra.mxu0 %v3450_v55 }
 0x11c   :  { %2542 = vmatprep.subr.bf16.mxu0 %v3456_v56  ;;  %2573 = vmatpush3.bf16.msra.mxu1 %v3569_v18 }
 0x11d   :  { %2574 = vmatprep.subr.bf16.mxu1 %v3578_v24 }
 0x11e   :  { %2433 = vmatmul.mubr.msk.bf16.gmra.mrb[20].mxu0 %vm739_vm8, %v738_v9 }
 0x11f   :  { %2543 = vmatpush3.bf16.msra.mxu0 %v3462_v8 }
 0x120   :  { %2544 = vmatprep.subr.bf16.mxu0 %v3470_v57  ;;  %2575 = vmatpush3.bf16.msra.mxu1 %v3588_v26 }
 0x121   :  { %2576 = vmatprep.subr.bf16.mxu1 %v3596_v21 }
 0x123   :  { %2545 = vmatpush3.bf16.msra.mxu0 %v3475_v39 }
 0x124   :  { %2546 = vmatprep.subr.bf16.mxu0 %v3482_v59  ;;  %2577 = vmatpush3.bf16.msra.mxu1 %v3601_v27 }
 0x125   :  { %2578 = vmatprep.subr.bf16.mxu1 %v3608_v29 }
 0x127   :  { %2547 = vmatpush3.bf16.msra.mxu0 %v3492_v61 }
 0x128   :  { %2548 = vmatprep.subr.bf16.mxu0 %v3506_v20  ;;  %2579 = vmatpush3.bf16.msra.mxu1 %v3613_v31 }
 0x129   :  { %2580 = vmatprep.subr.bf16.mxu1 %v3620_v15 }
 0x12b   :  { %2549 = vmatpush3.bf16.msra.mxu0 %v3516_v0 }
 0x12c   :  { %2550 = vmatprep.subr.bf16.mxu0 %v3530_v6  ;;  %2581 = vmatpush3.bf16.msra.mxu1 %v3625_v35 }
 0x12d   :  { %2604 = vmatprep.subr.bf16.mxu1 %v3421_v52 }
 0x12f   :  { %2551 = vmatpush3.bf16.msra.mxu0 %v3540_v11 }
 0x130   :  { %2552 = vmatprep.subr.bf16.mxu0 %v3554_v17 }
 0x133   :  { %2553 = vmatpush3.bf16.msra.mxu0 %v3564_v16 }
 0x134   :  { %2699 = vmatprep.subr.bf16.mxu0 %v3583_v25 }
 0x1d1   :  { %v2529_v43 = vpop.f32.mrb[4].mxu0 }
 0x1d2   :  { %v2530_v44 = vpop.f32.mrb[5].mxu0 }
 0x1d3   :  { %v2531_v45 = vadd.f32 %v2530_v44, %v2529_v43  ;;  %v2532_v14 = vpop.f32.mrb[6].mxu0 }
 0x1d4   :  { %v2533_v48 = vpop.f32.mrb[7].mxu0 }
 0x1d5   :  { %v2534_v49 = vadd.f32 %v2533_v48, %v2532_v14  ;;  %v646_v52 = vadd.f32 %v2531_v45, %v2395_v50 }
 0x1d7   :  { %v649_v48 = vadd.f32 %v2534_v49, %v2395_v50 }
 0x1d9   :  { %v686_v9 = vpop.f32.mrb[8].mxu1  ;;  %v798_v34 = vpop.f32.mrb[8].mxu0 }
 0x1da   :  { %v3671_v3 = vadd.f32 %v686_v9, %v646_v52  ;;  %v951_v43 = vmul.f32 %v3657_v28, %v798_v34  ;;  %v688_v44 = vpop.f32.mrb[9].mxu1  ;;  %v800_v14 = vpop.f32.mrb[9].mxu0 }
 0x1db   :  { %v952_v1 = vmul.f32 %v3661_v51, %v800_v14  ;;  %v689_v45 = vpop.f32.mrb[10].mxu1  ;;  %v802_v4 = vpop.f32.mrb[10].mxu0 }
 0x1dc   :  { %4071 = vst [vmem:[#allocation13_spill] sm:$0xff] %v3671_v3  ;;  %v993_v42 = vadd.f32 %v3665_v53, %v951_v43  ;;  %v3676_v10 = vadd.f32 %v689_v45, %v649_v48  ;;  %v956_v2 = vmul.f32 %v3657_v28, %v802_v4  ;;  %v804_v36 = vpop.f32.mrb[11].mxu0  ;;  %v691_v33 = vpop.f32.mrb[11].mxu1 }
 0x1dd   :  { %v994_v52 = vadd.f32 %v3669_v37, %v952_v1  ;;  %v957_v9 = vmul.f32 %v3661_v51, %v804_v36 }
 0x1de   :  { %v998_v49 = vadd.f32 %v3665_v53, %v956_v2  ;;  %v1008_v44 = vmax.f32 %v993_v42, 0.0 }
 0x1df   :  { %v999_v50 = vadd.f32 %v3669_v37, %v957_v9  ;;  %v1009_v43 = vmax.f32 %v994_v52, 0.0  ;;  %v3694_v52 = vld [vmem:[%s4001_s11 + $0x108] sm:$0xff]  }
 0x1e0   :  { %v1013_v14 = vmax.f32 %v998_v49, 0.0 }
 0x1e1   :  { %v1014_v48 = vmax.f32 %v999_v50, 0.0  ;;  %v808_v45 = vpop.f32.mrb[12].mxu0  ;;  %v3685_v58 = vpop.f32.mrb[12].mxu1 }
 0x1e2   :  { %v1118_v4 = vpack.c.bf16 %v1013_v14, %v1008_v44  ;;  %v961_v33 = vmul.f32 %v3657_v28, %v808_v45  ;;  %v810_v1 = vpop.f32.mrb[13].mxu0  ;;  %v900_v30 = vpop.f32.mrb[13].mxu1  ;;  %v3711_v45 = vrot.slane %v3643_v38, %v3366_v46 }
 0x1e3   :  { %v962_v36 = vmul.f32 %v3661_v51, %v810_v1  ;;  %v1119_v35 = vpack.c.bf16 %v1014_v48, %v1009_v43  ;;  %v812_v34 = vpop.f32.mrb[14].mxu0  ;;  %v955_v2 = vmul.f32 %v3638_v41, %v900_v30  ;;  %v2698_v3 = vpop.f32.mrb[14].mxu1  ;;  %v3701_v30 = vrot.slane %v3635_v13, %v3366_v46 }
 0x1e4   :  { %v1003_v42 = vadd.f32 %v3665_v53, %v961_v33  ;;  %v813_v9 = vpop.f32.mrb[15].mxu0  ;;  %v903_v49 = vpop.f32.mrb[15].mxu1  ;;  %v3706_v43 = vrot.slane %v3635_v13, %v3369_v47  ;;  %v3721_v13 = vrot.slane %v3643_v38, %v3369_v47  ;;  %v3732_v47 = vld [vmem:[%s4001_s11 + $0x118] sm:$0xff]   ;;  %v920_v38 = vmul.f32 8.0, %v3304_v23  ;;  %v3744_v23 = vld [vmem:[%s4001_s11 + $0x120] sm:$0xff]  }
 0x1e5   :  { %v1004_v50 = vadd.f32 %v3669_v37, %v962_v36  ;;  %1407 = vmatprep.mubr.bf16.mxu0 %v1119_v35  ;;  %v997_v44 = vadd.f32 %v3646_v40, %v955_v2  ;;  %v960_v14 = vmul.f32 %v3638_v41, %v903_v49 }
 0x1e6   :  { %v1018_v34 = vmax.f32 %v1003_v42, 0.0  ;;  %1408 = vmatmul.mubr.bf16.vlgmr.msra.gmra.mrb[24].mxu0 %v1118_v4  ;;  %v3717_v4 = vld [vmem:[%s4001_s11 + $0x110] sm:$0xff]  }
 0x1e7   :  { %v1019_v3 = vmax.f32 %v1004_v50, 0.0  ;;  %2700 = vmatpush3.bf16.msra.mxu0 %v3583_v25  ;;  %v1012_v48 = vmax.f32 %v997_v44, 0.0  ;;  %v1002_v35 = vadd.f32 %v3646_v40, %v960_v14 }
 0x1e8   :  { %2701 = vmatprep.subr.bf16.mxu0 %v3694_v52  ;;  %v1123_v2 = vpack.c.bf16 %v1018_v34, %v1018_v34 }
 0x1e9   :  { %v1124_v33 = vpack.c.bf16 %v1019_v3, %v1019_v3  ;;  %v849_v1 = vpop.f32.mrb[16].mxu0  ;;  %v1017_v36 = vmax.f32 %v1002_v35, 0.0 }
 0x1ea   :  { %v953_v42 = vmul.f32 %v3701_v30, %v849_v1  ;;  %v851_v9 = vpop.f32.mrb[17].mxu0 }
 0x1eb   :  { %v954_v46 = vmul.f32 %v3706_v43, %v851_v9  ;;  %2702 = vmatpush3.bf16.msra.mxu0 %v3694_v52  ;;  %v853_v49 = vpop.f32.mrb[18].mxu0  ;;  %1415 = vmatprep.mubr.bf16.mxu0 %v1124_v33  ;;  %v1122_v50 = vpack.c.bf16 %v1017_v36, %v1012_v48 }
 0x1ec   :  { %v995_v44 = vadd.f32 %v3711_v45, %v953_v42  ;;  %v958_v14 = vmul.f32 %v3701_v30, %v853_v49  ;;  %v855_v3 = vpop.f32.mrb[19].mxu0  ;;  %2703 = vmatprep.subr.bf16.mxu0 %v3717_v4  ;;  %v1024_v49 = vmul.f32 %v3661_v51, %v920_v38 }
 0x1ed   :  { %v996_v34 = vadd.f32 %v3721_v13, %v954_v46  ;;  %v959_v35 = vmul.f32 %v3706_v43, %v855_v3 }
 0x1ee   :  { %v1010_v33 = vmax.f32 %v995_v44, 0.0  ;;  %v1000_v48 = vadd.f32 %v3711_v45, %v958_v14  ;;  %1416 = vmatmul.mubr.bf16.gmra.mrb[28].mxu0 %v1123_v2 }
 0x1ef   :  { %v1011_v1 = vmax.f32 %v996_v34, 0.0  ;;  %v1001_v36 = vadd.f32 %v3721_v13, %v959_v35  ;;  %2704 = vmatpush3.bf16.msra.mxu0 %v3717_v4  ;;  %2715 = vmatprep.mubr.bf16.mxu0 %v1122_v50 }
 0x1f0   :  { %v1015_v42 = vmax.f32 %v1000_v48, 0.0  ;;  %2705 = vmatprep.subr.bf16.mxu0 %v3732_v47  ;;  %v3755_v48 = vld [vmem:[%s4001_s11 + $0x128] sm:$0xff]  }
 0x1f1   :  { %v1016_v9 = vmax.f32 %v1001_v36, 0.0  ;;  %v859_v46 = vpop.f32.mrb[20].mxu0 }
 0x1f2   :  { %v1120_v44 = vpack.c.bf16 %v1015_v42, %v1010_v33  ;;  %v963_v2 = vmul.f32 %v3701_v30, %v859_v46  ;;  %v861_v14 = vpop.f32.mrb[21].mxu0  ;;  %v1029_v33 = vadd.f32 %v1024_v49, %v3669_v37 }
 0x1f3   :  { %2706 = vmatpush3.bf16.msra.mxu0 %v3732_v47  ;;  %v964_v50 = vmul.f32 %v3706_v43, %v861_v14  ;;  %v1121_v3 = vpack.c.bf16 %v1016_v9, %v1011_v1  ;;  %v863_v34 = vpop.f32.mrb[22].mxu0  ;;  %v965_v1 = vmul.f32 %v3685_v58, %v3638_v41  ;;  %v3768_v9 = vld [vmem:[%s4001_s11 + $0x130] sm:$0xff]   ;;  %v3777_v58 = vld [vmem:[%s4001_s11 + $0x138] sm:$0xff]  }
 0x1f4   :  { %v1005_v35 = vadd.f32 %v3711_v45, %v963_v2  ;;  %2707 = vmatprep.subr.bf16.mxu0 %v3744_v23  ;;  %v864_v51 = vpop.f32.mrb[23].mxu0  ;;  %v1034_v46 = vmax.f32 %v1029_v33, 0.0 }
 0x1f5   :  { %v1006_v38 = vadd.f32 %v3721_v13, %v964_v50  ;;  %1455 = vmatprep.mubr.bf16.mxu1 %v1121_v3 }
 0x1f6   :  { %v1020_v36 = vmax.f32 %v1005_v35, 0.0  ;;  %1456 = vmatmul.mubr.bf16.vlgmr.msra.gmra.mrb[16].mxu1 %v1120_v44 }
 0x1f7   :  { %v1021_v42 = vmax.f32 %v1006_v38, 0.0  ;;  %2708 = vmatpush3.bf16.msra.mxu0 %v3744_v23  ;;  %2605 = vmatpush3.bf16.msra.mxu1 %v3437_v54  ;;  %v1007_v54 = vadd.f32 %v3646_v40, %v965_v1 }
 0x1f8   :  { %2709 = vmatprep.subr.bf16.mxu0 %v3755_v48  ;;  %2606 = vmatprep.subr.bf16.mxu1 %v3442_v32  ;;  %v1125_v49 = vpack.c.bf16 %v1020_v36, %v1020_v36  ;;  %v1520_v32 = vpack.c.bf16 %v1034_v46, %v1034_v46 }
 0x1f9   :  { %v1126_v37 = vpack.c.bf16 %v1021_v42, %v1021_v42  ;;  %v1022_v41 = vmax.f32 %v1007_v54, 0.0 }
 0x1fb   :  { %2710 = vmatpush3.bf16.msra.mxu0 %v3755_v48  ;;  %2607 = vmatpush3.bf16.msra.mxu1 %v3450_v55  ;;  %v919_v55 = vmul.f32 8.0, %v3296_v22  ;;  %v1127_v40 = vpack.c.bf16 %v1022_v41, %v1022_v41 }
 0x1fc   :  { %1463 = vmatprep.mubr.bf16.mxu1 %v1126_v37  ;;  %2711 = vmatprep.subr.bf16.mxu0 %v3768_v9 }
 0x1fd   :  { %2608 = vmatprep.subr.bf16.mxu1 %v3456_v56  ;;  %v1023_v56 = vmul.f32 %v3657_v28, %v919_v55 }
 0x1fe   :  { %1464 = vmatmul.mubr.bf16.gmra.mrb[20].mxu1 %v1125_v49 }
 0x1ff   :  { %2712 = vmatpush3.bf16.msra.mxu0 %v3768_v9  ;;  %2609 = vmatpush3.bf16.msra.mxu1 %v3462_v8  ;;  %v1028_v22 = vadd.f32 %v1023_v56, %v3665_v53 }
 0x200   :  { %2713 = vmatprep.subr.bf16.mxu0 %v3777_v58  ;;  %2610 = vmatprep.subr.bf16.mxu1 %v3470_v57 }
 0x201   :  { %1556 = vmatprep.mubr.bf16.mxu1 %v1520_v32  ;;  %v1033_v8 = vmax.f32 %v1028_v22, 0.0 }
 0x203   :  { %2714 = vmatpush3.bf16.msra.mxu0 %v3777_v58  ;;  %2611 = vmatpush3.bf16.msra.mxu1 %v3475_v39  ;;  %v1519_v57 = vpack.c.bf16 %v1033_v8, %v1033_v8  ;;  %v4072_v39 = vmov 0.0   ;;  %v4081_v8 = vld [vmem:[#allocation6_spill] sm:$0xff] }
 0x204   :  { %2612 = vmatprep.subr.bf16.mxu1 %v3482_v59  ;;  %2626 = vmatprep.subr.bf16.mxu0 %v3487_v60  ;;  %v4073_v59 = vld [vmem:[#allocation11_spill] sm:$0xff]  ;;  %v4074_v60 = vld [vmem:[#allocation12_spill] sm:$0xff] }
 0x206   :  { %2716 = vmatmul.mubr.bf16.vlgmr.msra.gmra.mrb[32].mxu0 %v1127_v40 }
 0x207   :  { %2613 = vmatpush3.bf16.msra.mxu1 %v3492_v61  ;;  %2627 = vmatpush3.bf16.msra.mxu0 %v3497_v62  ;;  %v1037_v61 = vmax.f32 %v4074_v60, 0.0 }
 0x208   :  { %2614 = vmatprep.subr.bf16.mxu1 %v3506_v20  ;;  %2628 = vmatprep.subr.bf16.mxu0 %v3511_v63  ;;  %v4075_v20 = vld [vmem:[#allocation13_spill] sm:$0xff] }
 0x209   :  { %v1523_v62 = vpack.c.bf16 %v1037_v61, %v1037_v61  ;;  %v4076_v63 = vpack.c.bf16 %v3676_v10, %v4075_v20  ;;  %v4079_v10 = vld [vmem:[#allocation9_spill] sm:$0xff] }
 0x20b   :  { %2615 = vmatpush3.bf16.msra.mxu1 %v3516_v0  ;;  %2629 = vmatpush3.bf16.msra.mxu0 %v3521_v5  ;;  %v1701_v0 = vsel %vm1699_vm10, %v4076_v63, 0  ;;  %v4077_v5 = vld [vmem:[#allocation8_spill] sm:$0xff] }
 0x20c   :  { %2616 = vmatprep.subr.bf16.mxu1 %v3530_v6  ;;  %2630 = vmatprep.subr.bf16.mxu0 %v3535_v7  ;;  %v922_v6 = vmul.f32 8.0, %v4077_v5  ;;  %v4078_v7 = vld [vmem:[#allocation10_spill] sm:$0xff] }
 0x20f   :  { %2617 = vmatpush3.bf16.msra.mxu1 %v3540_v11  ;;  %2631 = vmatpush3.bf16.msra.mxu0 %v3545_v12  ;;  %v921_v11 = vmul.f32 8.0, %v4078_v7  ;;  %v1026_v12 = vmul.f32 %v3706_v43, %v922_v6 }
 0x210   :  { %2618 = vmatprep.subr.bf16.mxu1 %v3554_v17  ;;  %2632 = vmatprep.subr.bf16.mxu0 %v3559_v19 }
 0x211   :  { %v1025_v17 = vmul.f32 %v3701_v30, %v921_v11  ;;  %v1031_v19 = vadd.f32 %v1026_v12, %v3721_v13  ;;  %v4080_v13 = vld [vmem:[#allocation7_spill] sm:$0xff] }
 0x213   :  { %2619 = vmatpush3.bf16.msra.mxu1 %v3564_v16  ;;  %2633 = vmatpush3.bf16.msra.mxu0 %v3569_v18  ;;  %v1030_v16 = vadd.f32 %v1025_v17, %v3711_v45  ;;  %v1036_v18 = vmax.f32 %v1031_v19, 0.0  ;;  %v1128_v45 = vld [vmem:[%s4002_s12] sm:$0x1] }
 0x214   :  { %2719 = vmatprep.subr.bf16.mxu1 %v4072_v39  ;;  %2634 = vmatprep.subr.bf16.mxu0 %v3578_v24 }
 0x215   :  { %v1035_v24 = vmax.f32 %v1030_v16, 0.0 }
 0x216   :  { %1557 = vmatmul.mubr.bf16.vlgmr.msra.gmra.mrb[24].mxu1 %v1519_v57 }
 0x217   :  { %2720 = vmatpush3.bf16.msra.mxu1 %v3583_v25  ;;  %2735 = vmatprep.mubr.msk.bf16.mxu1 %vm2947_vm5, %v4072_v39  ;;  %v1522_v25 = vpack.c.bf16 %v1036_v18, %v1036_v18 }
 0x218   :  { %2721 = vmatprep.subr.bf16.mxu1 %v4072_v39  ;;  %2635 = vmatpush3.bf16.msra.mxu0 %v3588_v26  ;;  %v1521_v26 = vpack.c.bf16 %v1035_v24, %v1035_v24 }
 0x219   :  { %2636 = vmatprep.subr.bf16.mxu0 %v3596_v21  ;;  %1596 = vmatprep.mubr.bf16.mxu0 %v1522_v25 }
 0x21b   :  { %2722 = vmatpush3.bf16.msra.mxu1 %v3694_v52 }
 0x21c   :  { %2723 = vmatprep.subr.bf16.mxu1 %v4072_v39  ;;  %2637 = vmatpush3.bf16.msra.mxu0 %v3601_v27 }
 0x21d   :  { %2638 = vmatprep.subr.bf16.mxu0 %v3608_v29 }
 0x21f   :  { %2724 = vmatpush3.bf16.msra.mxu1 %v3717_v4 }
 0x220   :  { %2725 = vmatprep.subr.bf16.mxu1 %v4072_v39  ;;  %2639 = vmatpush3.bf16.msra.mxu0 %v3613_v31 }
 0x221   :  { %2640 = vmatprep.subr.bf16.mxu0 %v3620_v15 }
 0x223   :  { %2726 = vmatpush3.bf16.msra.mxu1 %v3732_v47  ;;  %v1133_v47 = vrot.slane %v1128_v45, %v4080_v13 }
 0x224   :  { %2727 = vmatprep.subr.bf16.mxu1 %v4072_v39  ;;  %2641 = vmatpush3.bf16.msra.mxu0 %v4073_v59 }
 0x225   :  { %2739 = vmatprep.subr.bf16.mxu0 %v4072_v39 }
 0x227   :  { %2728 = vmatpush3.bf16.msra.mxu1 %v3744_v23  ;;  %1597 = vmatmul.mubr.bf16.vlgmr.msra.gmra.mrb[36].mxu0 %v1521_v26 }
 0x228   :  { %2729 = vmatprep.subr.bf16.mxu1 %v4072_v39  ;;  %2743 = vmatprep.mubr.msk.bf16.mxu0 %vm2947_vm5, %v4072_v39 }
 0x22b   :  { %2730 = vmatpush3.bf16.msra.mxu1 %v3755_v48 }
 0x22c   :  { %2731 = vmatprep.subr.bf16.mxu1 %v4072_v39 }
 0x22f   :  { %2732 = vmatpush3.bf16.msra.mxu1 %v3768_v9 }
 0x230   :  { %2733 = vmatprep.subr.bf16.mxu1 %v4072_v39 }
 0x233   :  { %2734 = vmatpush3.bf16.msra.mxu1 %v3777_v58 }
 0x234   :  { %2747 = vmatprep.subr.bf16.mxu1 %v4072_v39 }
 0x236   :  { %2736 = vmatmul.mubr.bf16.vlgmr.msra.gmra.mrb[28].mxu1 %v1523_v62 }
 0x237   :  { %2748 = vmatpush3.bf16.msra.mxu1 %v1701_v0  ;;  %2749 = vmatprep.mubr.msk.bf16.mxu1 %vm2947_vm5, %v4072_v39 }
 0x238   :  { %2761 = vmatprep.subr.bf16.mxu1 %v4072_v39 }
 0x23e   :  { %2750 = vmatmul.mubr.msk.bf16.vlgmr.msra.gmra.mrb[32].mxu1 %vm1695_vm15, %v4079_v10 }
 0x23f   :  { %2769 = vmatprep.mubr.msk.bf16.mxu1 %vm2947_vm5, %v4072_v39 }
 0x2b9   :  { %v2554_v21 = vpop.f32.mrb[24].mxu0 }
 0x2ba   :  { %v2555_v27 = vpop.f32.mrb[25].mxu0 }
 0x2bb   :  { %v2556_v29 = vadd.f32 %v2555_v27, %v2554_v21  ;;  %v2557_v31 = vpop.f32.mrb[26].mxu0  ;;  %v2895_v27 = vld [vmem:[%s4003_s13] sm:$0xff]  }
 0x2bc   :  { %v2558_v15 = vpop.f32.mrb[27].mxu0 }
 0x2bd   :  { %v2559_v28 = vadd.f32 %v2558_v15, %v2557_v31  ;;  %v1410_v2 = vadd.f32 %v2556_v29, %v1133_v47  ;;  %v2896_v29 = vld [vmem:[%s4003_s13 + $0x8] sm:$0xff]   ;;  %v2897_v31 = vld [vmem:[%s4005_s15] sm:$0xff]   ;;  %s2948_s13 = smov 96  }
 0x2be   :  { %2762 = vmatpush3.bf16.msra.mxu1 %v2897_v31  ;;  %v2898_v15 = vld [vmem:[%s4005_s15 + $0x8] sm:$0xff]  }
 0x2bf   :  { %v1413_v34 = vadd.f32 %v2559_v28, %v1133_v47  ;;  %2763 = vmatprep.subr.bf16.mxu1 %v4072_v39 }
 0x2c1   :  { %v2560_v53 = vpop.f32.mrb[28].mxu0 }
 0x2c2   :  { %v2561_v52 = vpop.f32.mrb[29].mxu0  ;;  %2764 = vmatpush3.bf16.msra.mxu1 %v2898_v15 }
 0x2c3   :  { %v2562_v30 = vadd.f32 %v2561_v52, %v2560_v53  ;;  %v2563_v43 = vpop.f32.mrb[30].mxu0  ;;  %2765 = vmatprep.subr.bf16.mxu1 %v4072_v39 }
 0x2c4   :  { %v2564_v4 = vpop.f32.mrb[31].mxu0 }
 0x2c5   :  { %v1418_v36 = vadd.f32 %v2562_v30, %v1133_v47 }
 0x2c9   :  { %v2582_v23 = vpop.f32.mrb[16].mxu1 }
 0x2ca   :  { %v2583_v44 = vpop.f32.mrb[17].mxu1 }
 0x2cb   :  { %v2584_v14 = vadd.f32 %v2583_v44, %v2582_v23  ;;  %v2585_v50 = vpop.f32.mrb[18].mxu1 }
 0x2cc   :  { %v2586_v3 = vpop.f32.mrb[19].mxu1 }
 0x2cd   :  { %v2587_v35 = vadd.f32 %v2586_v3, %v2585_v50  ;;  %v1458_v48 = vadd.f32 %v2584_v14, %v1410_v2  ;;  %v2900_v2 = vld [vmem:[%s4005_s15 + $0x18] sm:$0xff]   ;;  %v2478_v14 = vld [vmem:[%s4004_s14] ss:$0 sm:$0xff] }
 0x2cf   :  { %v1461_v51 = vadd.f32 %v2587_v35, %v1413_v34 }
 0x2d1   :  { %v2588_v38 = vpop.f32.mrb[20].mxu1 }
 0x2d2   :  { %v2589_v33 = vpop.f32.mrb[21].mxu1 }
 0x2d3   :  { %v2590_v42 = vadd.f32 %v2589_v33, %v2588_v38  ;;  %v2591_v1 = vpop.f32.mrb[22].mxu1 }
 0x2d4   :  { %v2592_v9 = vpop.f32.mrb[23].mxu1 }
 0x2d5   :  { %v1466_v37 = vadd.f32 %v2590_v42, %v1418_v36  ;;  %v2482_v42 = vld [vmem:[%s4006_s16] ss:$0 sm:$0xff] }
 0x2d9   :  { %v2717_v46 = vpop.f32.mrb[32].mxu0 }
 0x2da   :  { %v1514_v49 = vadd.f32 %v2717_v46, %v1466_v37  ;;  %v1505_v54 = vpop.f32.mrb[33].mxu0 }
 0x2db   :  { %v1506_v58 = vadd.f32 %v1505_v54, %v1458_v48  ;;  %v2718_v32 = vpop.f32.mrb[34].mxu0 }
 0x2dc   :  { %v1508_v41 = vpop.f32.mrb[35].mxu0  ;;  %v1645_v56 = vpack.c.bf16 %v1514_v49, %v1514_v49 }
 0x2dd   :  { %v1509_v55 = vadd.f32 %v1508_v41, %v1461_v51 }
 0x2de   :  { %v1651_v22 = vsel %vm203_vm1, %v1645_v56, 0  ;;  %vm1768_vm1 = vcmask 261120  }
 0x2df   :  { %v1644_v40 = vpack.c.bf16 %v1509_v55, %v1506_v58 }
 0x2e1   :  { %2740 = vmatpush3.bf16.msra.mxu0 %v1644_v40 }
 0x2e2   :  { %2741 = vmatprep.subr.bf16.mxu0 %v4072_v39 }
 0x2e5   :  { %2742 = vmatpush3.bf16.msra.mxu0 %v1651_v22 }
 0x2e6   :  { %2753 = vmatprep.subr.bf16.mxu0 %v4072_v39 }
 0x2e8   :  { %2744 = vmatmul.mubr.msk.bf16.vlgmr.msra.gmra.mrb[40].mxu0 %vm117_vm12, %v4081_v8  ;;  %vm1900_vm12 = vcmask 257024  }
 0x2e9   :  { %v2620_v57 = vpop.f32.mrb[24].mxu1  ;;  %2757 = vmatprep.mubr.msk.bf16.mxu0 %vm2947_vm5, %v4072_v39  ;;  %2754 = vmatpush3.bf16.msra.mxu0 %v2895_v27 }
 0x2ea   :  { %v2621_v59 = vpop.f32.mrb[25].mxu1  ;;  %2755 = vmatprep.subr.bf16.mxu0 %v4072_v39 }
 0x2eb   :  { %v2622_v60 = vadd.f32 %v2621_v59, %v2620_v57  ;;  %v2623_v61 = vpop.f32.mrb[26].mxu1 }
 0x2ec   :  { %v2624_v62 = vpop.f32.mrb[27].mxu1 }
 0x2ed   :  { %v1559_v17 = vadd.f32 %v2622_v60, %v1128_v45  ;;  %2756 = vmatpush3.bf16.msra.mxu0 %v2896_v29 }
 0x2ee   :  { %2773 = vmatprep.subr.bf16.mxu0 %v4072_v39 }
 0x2fa   :  { %v2642_v19 = vpop.f32.mrb[36].mxu0 }
 0x2fb   :  { %v2643_v16 = vpop.f32.mrb[37].mxu0 }
 0x2fc   :  { %v2644_v18 = vadd.f32 %v2643_v16, %v2642_v19  ;;  %v2645_v24 = vpop.f32.mrb[38].mxu0 }
 0x2fd   :  { %v2646_v25 = vpop.f32.mrb[39].mxu0 }
 0x2fe   :  { %v1599_v26 = vadd.f32 %v2644_v18, %v1559_v17 }
 0x309   :  { %v1638_v20 = vpop.f32.mrb[28].mxu1 }
 0x30a   :  { %v2737_v63 = vpop.f32.mrb[29].mxu1  ;;  %v1639_v21 = vadd.f32 %v1638_v20, %v1599_v26 }
 0x30b   :  { %v1641_v0 = vpop.f32.mrb[30].mxu1 }
 0x30c   :  { %v2738_v5 = vpop.f32.mrb[31].mxu1  ;;  %v1649_v28 = vrot.slane %v1639_v21, %v4080_v13  ;;  %v2899_v13 = vld [vmem:[%s4005_s15 + $0x10] sm:$0xff]  }
 0x30d   :  { %2766 = vmatpush3.bf16.msra.mxu1 %v2899_v13 }
 0x30e   :  { %2767 = vmatprep.subr.bf16.mxu1 %v4072_v39 }
 0x311   :  { %v1737_v6 = vpop.f32.mrb[32].mxu1  ;;  %2768 = vmatpush3.bf16.msra.mxu1 %v2900_v2 }
 0x312   :  { %v2751_v7 = vpop.f32.mrb[33].mxu1  ;;  %2787 = vmatprep.subr.bf16.mxu1 %v4072_v39 }
 0x313   :  { %v1740_v11 = vpop.f32.mrb[34].mxu1 }
 0x314   :  { %v2752_v12 = vpop.f32.mrb[35].mxu1 }
 0x3bb   :  { %v1687_v53 = vpop.f32.mrb[40].mxu0 }
 0x3bc   :  { %v1688_v52 = vadd.f32 %v1687_v53, %v1649_v28  ;;  %v2745_v30 = vpop.f32.mrb[41].mxu0 }
 0x3bd   :  { %v1690_v43 = vpop.f32.mrb[42].mxu0 }
 0x3be   :  { %v1738_v45 = vadd.f32 %v1737_v6, %v1688_v52  ;;  %v1691_v4 = vadd.f32 %v1690_v43, %v1649_v28  ;;  %1944 = vrot.lane.b32.xlu0 %v1688_v52, %s2948_s13  ;;  %v2746_v47 = vpop.f32.mrb[43].mxu0 }
 0x3bf   :  { %v2901_v47 = vld [vmem:[%s4007_s17] sm:$0xff]  }
 0x3c0   :  { %v1741_v23 = vadd.f32 %v1740_v11, %v1691_v4 }
 0x3c2   :  { %v1748_v44 = vpack.c.bf16 %v1741_v23, %v1738_v45  ;;  %1946 = vrot.lane.b32.xlu0 %v1691_v4, %s2948_s13  ;;  %v2902_v23 = vld [vmem:[%s4007_s17 + $0x8] sm:$0xff]   ;;  %s4082_s13 = sld [smem:[#allocation16_spill]] }
 0x3c4   :  { %2758 = vmatmul.mubr.msk.bf16.vlgmr.msra.gmra.mrb[44].mxu0 %vm1768_vm1, %v1748_v44  ;;  %v2904_v44 = vld [vmem:[%s4009_s19 + $0x8] sm:$0xff]  }
 0x3c5   :  { %2775 = vmatprep.mubr.msk.bf16.mxu0 %vm2947_vm5, %v4072_v39 }
 0x430   :  { %v1945_v13 = vpop.permute.xlu0 %1944 }
 0x497   :  { %v1806_v50 = vpop.f32.mrb[44].mxu0 }
 0x498   :  { %v1807_v3 = vadd.f32 %v2478_v14, %v1806_v50  ;;  %v2759_v34 = vpop.f32.mrb[45].mxu0  ;;  %v1947_v50 = vpop.permute.xlu0 %1946 }
 0x499   :  { %v1809_v35 = vpop.f32.mrb[46].mxu0 }
 0x49a   :  { %v1810_v48 = vadd.f32 %v2478_v14, %v1809_v35  ;;  %v2760_v51 = vpop.f32.mrb[47].mxu0  ;;  %v1813_v38 = vmax.f32 %v1807_v3, 0.0 }
 0x49c   :  { %v1814_v33 = vmax.f32 %v1810_v48, 0.0 }
 0x49e   :  { %v1823_v36 = vpack.c.bf16 %v1814_v33, %v1813_v38  ;;  %v2905_v38 = vld [vmem:[%s4009_s19 + $0x10] sm:$0xff]   ;;  %v2906_v33 = vld [vmem:[%s4009_s19 + $0x18] sm:$0xff]  }
 0x4a0   :  { %2770 = vmatmul.mubr.msk.bf16.vlgmr.msra.gmra.mrb[36].mxu1 %vm607_vm13, %v1823_v36  ;;  %v2176_v36 = vld [vmem:[%s4082_s13] sm:$0x3] }
 0x4a1   :  { %2795 = vmatprep.mubr.msk.bf16.mxu1 %vm2947_vm5, %v4072_v39  ;;  %2178 = vperm.xlu1 %2825, %v2176_v36  }
 0x573   :  { %v1892_v1 = vpop.f32.mrb[36].mxu1 }
 0x574   :  { %v1893_v9 = vadd.f32 %v2482_v42, %v1892_v1  ;;  %v2771_v37 = vpop.f32.mrb[37].mxu1 }
 0x575   :  { %v1895_v46 = vpop.f32.mrb[38].mxu1 }
 0x576   :  { %v1896_v49 = vadd.f32 %v2482_v42, %v1895_v46  ;;  %v2772_v54 = vpop.f32.mrb[39].mxu1  ;;  %v1899_v58 = vsel %vm1768_vm1, %v1893_v9, 0.0  ;;  %v2491_v42 = vld [vmem:[%s4008_s18] ss:$0 sm:$0xff] }
 0x578   :  { %v1901_v32 = vsel %vm1900_vm12, %v1896_v49, 0.0 }
 0x579   :  { %v1902_v41 = vadd.f32 %v1901_v32, %v1899_v58 }
 0x57b   :  { %v1903_v55 = vrot.slane %v1902_v41, 4 }
 0x57d   :  { %v1904_v40 = vadd.f32 %v1903_v55, %v1902_v41  ;;  %v2495_v55 = vld [vmem:[%s4010_s20] ss:$0 sm:$0xff] }
 0x57f   :  { %v1905_v56 = vrot.slane %v1904_v40, 2 }
 0x581   :  { %v1906_v22 = vadd.f32 %v1905_v56, %v1904_v40 }
 0x583   :  { %v1907_v8 = vrot.slane %v1906_v22, 1 }
 0x585   :  { %v1908_v57 = vadd.f32 %v1907_v8, %v1906_v22 }
 0x587   :  { %v1910_v59 = vmul.f32 0.083333336, %v1908_v57 }
 0x589   :  { %v1911_v60 = vsub.f32 %v1893_v9, %v1910_v59  ;;  %v1912_v61 = vsub.f32 %v1896_v49, %v1910_v59 }
 0x58b   :  { %v1913_v62 = vmul.f32 %v1911_v60, %v1911_v60  ;;  %v1914_v20 = vmul.f32 %v1912_v61, %v1912_v61 }
 0x58d   :  { %v1915_v63 = vsel %vm1768_vm1, %v1913_v62, 0.0  ;;  %v1916_v0 = vsel %vm1900_vm12, %v1914_v20, 0.0 }
 0x58e   :  { %v1917_v5 = vadd.f32 %v1916_v0, %v1915_v63 }
 0x590   :  { %v1918_v6 = vrot.slane %v1917_v5, 4 }
 0x592   :  { %v1919_v7 = vadd.f32 %v1918_v6, %v1917_v5 }
 0x594   :  { %v1920_v11 = vrot.slane %v1919_v7, 2 }
 0x596   :  { %v1921_v12 = vadd.f32 %v1920_v11, %v1919_v7 }
 0x598   :  { %v1922_v17 = vrot.slane %v1921_v12, 1 }
 0x59a   :  { %v1923_v19 = vadd.f32 %v1922_v17, %v1921_v12 }
 0x59c   :  { %v1924_v16 = vmul.f32 0.083333336, %v1923_v19 }
 0x59e   :  { %v1925_v18 = vadd.f32 1e-05, %v1924_v16 }
 0x5a0   :  { %2910 = vrsqrt.f32 %v1925_v18 }
 0x5aa   :  { %v2911_v24 = vpop.eup %2910 }
 0x5ab   :  { %v1927_v25 = vmul.f32 %v2911_v24, %v1911_v60  ;;  %v1928_v26 = vmul.f32 %v2911_v24, %v1912_v61 }
 0x5ad   :  { %v1931_v21 = vmin.f32 %v1927_v25, 0.0  ;;  %v1932_v27 = vmin.f32 %v1928_v26, 0.0  ;;  %vm1930_vm2 = vcmp.gt.f32.partialorder %v1928_v26, 0.0  ;;  %vm1929_vm3 = vcmp.gt.f32.partialorder %v1927_v25, 0.0 }
 0x5af   :  { %v1933_v29 = vmul.f32 1.442695, %v1931_v21  ;;  %v1935_v31 = vmul.f32 1.442695, %v1932_v27 }
 0x5b1   :  { %2912 = vpow2.f32 %v1935_v31 }
 0x5b2   :  { %2914 = vpow2.f32 %v1933_v29 }
 0x5bb   :  { %v2913_v15 = vpop.eup %2912 }
 0x5bc   :  { %v2915_v28 = vpop.eup %2914  ;;  %v2489_v53 = vadd.f32 -1.0, %v2913_v15 }
 0x5bd   :  { %v2488_v52 = vadd.f32 -1.0, %v2915_v28 }
 0x5be   :  { %v1940_v30 = vsel %vm1930_vm2, %v1928_v26, %v2489_v53 }
 0x5bf   :  { %v1939_v43 = vsel %vm1929_vm3, %v1927_v25, %v2488_v52  ;;  %v2179_v52 = vpop.permute.xlu1 %2178 }
 0x5c0   :  { %v1941_v45 = vpack.c.bf16 %v1940_v30, %v1939_v43  ;;  %v4083_v30 = vld [vmem:[#allocation5_spill] sm:$0xff] }
 0x5c1   :  { %vm2180_vm6 = vcmp.eq.s32.totalorder %v4083_v30, %v2179_v52 }
 0x5c2   :  { %v1951_v4 = vsel %vm1699_vm10, %v1941_v45, 0 }
 0x5c3   :  { %2774 = vmatpush3.bf16.msra.mxu0 %v1951_v4 }
 0x5c4   :  { %2779 = vmatprep.subr.bf16.mxu0 %v4072_v39 }
 0x5c6   :  { %2776 = vmatmul.mubr.msk.bf16.vlgmr.msra.gmra.mrb[48].mxu0 %vm1695_vm15, %v4079_v10  ;;  %v2903_v10 = vld [vmem:[%s4009_s19] sm:$0xff]  }
 0x5c7   :  { %2783 = vmatprep.mubr.msk.bf16.mxu0 %vm2947_vm5, %v4072_v39  ;;  %2780 = vmatpush3.bf16.msra.mxu0 %v2901_v47  ;;  %v2501_v47 = vsel %vm2180_vm6, 1.0, %v4072_v39 }
 0x5c8   :  { %2781 = vmatprep.subr.bf16.mxu0 %v4072_v39  ;;  %2788 = vmatpush3.bf16.msra.mxu1 %v2903_v10  ;;  %v2183_v10 = vpack.c.bf16 %v2501_v47, %v2501_v47 }
 0x5c9   :  { %2789 = vmatprep.subr.bf16.mxu1 %v4072_v39 }
 0x5cb   :  { %2782 = vmatpush3.bf16.msra.mxu0 %v2902_v23 }
 0x5cc   :  { %2799 = vmatprep.subr.bf16.mxu0 %v4072_v39  ;;  %2790 = vmatpush3.bf16.msra.mxu1 %v2904_v44 }
 0x5cd   :  { %2791 = vmatprep.subr.bf16.mxu1 %v4072_v39 }
 0x5d0   :  { %2792 = vmatpush3.bf16.msra.mxu1 %v2905_v38 }
 0x5d1   :  { %2793 = vmatprep.subr.bf16.mxu1 %v4072_v39 }
 0x5d4   :  { %2794 = vmatpush3.bf16.msra.mxu1 %v2906_v33 }
 0x5d5   :  { %2813 = vmatprep.subr.bf16.mxu1 %v4072_v39 }
 0x699   :  { %v1987_v2 = vpop.f32.mrb[48].mxu0 }
 0x69a   :  { %v2777_v14 = vpop.f32.mrb[49].mxu0  ;;  %v1988_v34 = vadd.f32 %v1987_v2, %v1945_v13  ;;  %v2907_v13 = vld [vmem:[%s4011_s21] sm:$0xff]   ;;  %v2908_v2 = vld [vmem:[%s4011_s21 + $0x8] sm:$0xff]  }
 0x69b   :  { %v1990_v3 = vpop.f32.mrb[50].mxu0 }
 0x69c   :  { %v1991_v35 = vadd.f32 %v1990_v3, %v1947_v50  ;;  %v2778_v48 = vpop.f32.mrb[51].mxu0 }
 0x69d   :  { %v2909_v48 = vld [vmem:[%s4013_s23] sm:$0xff]  }
 0x69e   :  { %v1998_v51 = vpack.c.bf16 %v1991_v35, %v1988_v34 }
 0x6a0   :  { %2784 = vmatmul.mubr.msk.bf16.vlgmr.msra.gmra.mrb[52].mxu0 %vm1768_vm1, %v1998_v51 }
 0x6a1   :  { %2801 = vmatprep.mubr.msk.bf16.mxu0 %vm2947_vm5, %v4072_v39 }
 0x773   :  { %v2055_v1 = vpop.f32.mrb[52].mxu0 }
 0x774   :  { %v2056_v9 = vadd.f32 %v2491_v42, %v2055_v1  ;;  %v2785_v37 = vpop.f32.mrb[53].mxu0 }
 0x775   :  { %v2058_v46 = vpop.f32.mrb[54].mxu0 }
 0x776   :  { %v2059_v49 = vadd.f32 %v2491_v42, %v2058_v46  ;;  %v2786_v54 = vpop.f32.mrb[55].mxu0  ;;  %v2062_v58 = vmax.f32 %v2056_v9, 0.0 }
 0x778   :  { %v2063_v32 = vmax.f32 %v2059_v49, 0.0 }
 0x77a   :  { %v2072_v41 = vpack.c.bf16 %v2063_v32, %v2062_v58  ;;  %v2508_v58 = vld [vmem:[%s4014_s24] ss:$0 sm:$0xff] }
 0x77c   :  { %2796 = vmatmul.mubr.msk.bf16.vlgmr.msra.gmra.mrb[40].mxu1 %vm607_vm13, %v2072_v41 }
 0x77d   :  { %2815 = vmatprep.mubr.msk.bf16.mxu1 %vm2947_vm5, %v4072_v39  ;;  %2814 = vmatpush3.bf16.msra.mxu1 %v2909_v48 }
 0x84f   :  { %v2141_v40 = vpop.f32.mrb[40].mxu1 }
 0x850   :  { %v2142_v56 = vadd.f32 %v2495_v55, %v2141_v40  ;;  %v2797_v22 = vpop.f32.mrb[41].mxu1 }
 0x851   :  { %v2144_v8 = vpop.f32.mrb[42].mxu1 }
 0x852   :  { %v2145_v57 = vadd.f32 %v2495_v55, %v2144_v8  ;;  %v2798_v59 = vpop.f32.mrb[43].mxu1  ;;  %v2148_v60 = vsel %vm1768_vm1, %v2142_v56, 0.0 }
 0x854   :  { %v2149_v61 = vsel %vm1900_vm12, %v2145_v57, 0.0 }
 0x855   :  { %v2150_v62 = vadd.f32 %v2149_v61, %v2148_v60 }
 0x857   :  { %v2151_v20 = vrot.slane %v2150_v62, 4 }
 0x859   :  { %v2152_v63 = vadd.f32 %v2151_v20, %v2150_v62 }
 0x85b   :  { %v2153_v0 = vrot.slane %v2152_v63, 2 }
 0x85d   :  { %v2154_v5 = vadd.f32 %v2153_v0, %v2152_v63 }
 0x85f   :  { %v2155_v6 = vrot.slane %v2154_v5, 1 }
 0x861   :  { %v2156_v7 = vadd.f32 %v2155_v6, %v2154_v5 }
 0x863   :  { %v2157_v11 = vmul.f32 0.083333336, %v2156_v7 }
 0x865   :  { %v2158_v12 = vsub.f32 %v2142_v56, %v2157_v11  ;;  %v2159_v17 = vsub.f32 %v2145_v57, %v2157_v11 }
 0x867   :  { %v2160_v19 = vmul.f32 %v2158_v12, %v2158_v12  ;;  %v2161_v16 = vmul.f32 %v2159_v17, %v2159_v17 }
 0x869   :  { %v2162_v18 = vsel %vm1768_vm1, %v2160_v19, 0.0  ;;  %v2163_v24 = vsel %vm1900_vm12, %v2161_v16, 0.0 }
 0x86a   :  { %v2164_v25 = vadd.f32 %v2163_v24, %v2162_v18 }
 0x86c   :  { %v2165_v26 = vrot.slane %v2164_v25, 4 }
 0x86e   :  { %v2166_v21 = vadd.f32 %v2165_v26, %v2164_v25 }
 0x870   :  { %v2167_v27 = vrot.slane %v2166_v21, 2 }
 0x872   :  { %v2168_v29 = vadd.f32 %v2167_v27, %v2166_v21 }
 0x874   :  { %v2169_v31 = vrot.slane %v2168_v29, 1 }
 0x876   :  { %v2170_v15 = vadd.f32 %v2169_v31, %v2168_v29 }
 0x878   :  { %v2171_v28 = vmul.f32 0.083333336, %v2170_v15 }
 0x87a   :  { %v2172_v53 = vadd.f32 1e-05, %v2171_v28 }
 0x87c   :  { %2916 = vrsqrt.f32 %v2172_v53 }
 0x886   :  { %v2917_v43 = vpop.eup %2916 }
 0x887   :  { %v2175_v45 = vmul.f32 %v2917_v43, %v2159_v17  ;;  %v2174_v4 = vmul.f32 %v2917_v43, %v2158_v12 }
 0x889   :  { %v2184_v23 = vpack.c.bf16 %v2175_v45, %v2174_v4 }
 0x88b   :  { %v2189_v44 = vsel %vm1699_vm10, %v2184_v23, 0 }
 0x88c   :  { %2800 = vmatpush3.bf16.msra.mxu0 %v2189_v44 }
 0x88d   :  { %2805 = vmatprep.subr.bf16.mxu0 %v4072_v39 }
 0x88f   :  { %2802 = vmatmul.mubr.msk.bf16.vlgmr.msra.gmra.mrb[56].mxu0 %vm1695_vm15, %v2183_v10 }
 0x890   :  { %2806 = vmatpush3.bf16.msra.mxu0 %v2907_v13  ;;  %2809 = vmatprep.mubr.msk.bf16.mxu0 %vm2947_vm5, %v4072_v39 }
 0x891   :  { %2807 = vmatprep.subr.bf16.mxu0 %v4072_v39  ;;  %v2503_v39 = vld [vmem:[%s4012_s22] ss:$0 sm:$0xff]  ;;  %s2949_s22 = smov [#allocation2]  }
 0x892   :  { %s2372_s16 = sshll.u32 %s2949_s22, 4  ;;  %s2373_s16 = int_to_ptr.vmem [resolvable:$true] %s2372_s16 }
 0x893   :  { %s2920_s3 = scalar_lea.vmem %s2373_s16, 32  ;;  %p2925_p1 = scmp.lt.s32.totalorder %s2373_s16, %s2373_s16 }
 0x894   :  { %2808 = vmatpush3.bf16.msra.mxu0 %v2908_v2  ;;  %p2921_p0 = scmp.ne.s32.totalorder %s2373_s16, %s2920_s3  ;;  %p2926_p2 = scmp.lt.s32.totalorder %s2920_s3, %s2920_s3 }
 0x896   :  { %p2927_p3 = por %p2926_p2, %p2925_p1 }
 0x898   :  { %p2928_p4 = pnand %p2927_p3, %p2921_p0 }
 0x962   :  { %v2225_v14 = vpop.f32.mrb[56].mxu0 }
 0x963   :  { %v2235_v50 = vpack.c.bf16 %v2225_v14, %v2225_v14  ;;  %v2803_v3 = vpop.f32.mrb[57].mxu0 }
 0x964   :  { %v2228_v34 = vpop.f32.mrb[58].mxu0 }
 0x965   :  { %2810 = vmatmul.mubr.msk.bf16.vlgmr.msra.gmra.mrb[60].mxu0 %vm1768_vm1, %v2235_v50  ;;  %v2804_v35 = vpop.f32.mrb[59].mxu0 }
 0xa38   :  { %v2292_v51 = vpop.f32.mrb[60].mxu0 }
 0xa39   :  { %v2293_v38 = vadd.f32 %v2503_v39, %v2292_v51  ;;  %v2811_v33 = vpop.f32.mrb[61].mxu0 }
 0xa3a   :  { %v2295_v36 = vpop.f32.mrb[62].mxu0 }
 0xa3b   :  { %v2299_v42 = vmin.f32 %v2293_v38, 0.0  ;;  %v2812_v1 = vpop.f32.mrb[63].mxu0  ;;  %vm2298_vm5 = vcmp.gt.f32.partialorder %v2293_v38, 0.0 }
 0xa3d   :  { %v2300_v9 = vmul.f32 1.442695, %v2299_v42 }
 0xa3f   :  { %2918 = vpow2.f32 %v2300_v9 }
 0xa49   :  { %v2919_v37 = vpop.eup %2918 }
 0xa4a   :  { %v2507_v46 = vadd.f32 -1.0, %v2919_v37 }
 0xa4c   :  { %v2303_v49 = vsel %vm2298_vm5, %v2293_v38, %v2507_v46 }
 0xa4d   :  { %v2306_v54 = vpack.c.bf16 %v2303_v49, %v2303_v49 }
 0xa4f   :  { %2816 = vmatmul.mubr.msk.bf16.vlgmr.msra.gmra.mrb[44].mxu1 %vm2320_vm11, %v2306_v54 }
 0xb22   :  { %v2358_v32 = vpop.f32.mrb[44].mxu1 }
 0xb23   :  { %v2359_v41 = vadd.f32 %v2508_v58, %v2358_v32  ;;  %v2817_v55 = vpop.f32.mrb[45].mxu1 }
 0xb24   :  { %v2361_v40 = vpop.f32.mrb[46].mxu1 }
 0xb25   :  { %v2818_v56 = vpop.f32.mrb[47].mxu1  ;;  %2365 = vst.msk [vmem:[#allocation2] sm:$0x3] %vm2364_vm14, %v2359_v41 }
 0xb26   :  { %2931 = shalt.err (!%p2928_p4)
}
 0xb27   :  { %s2932_s24 = scalar_lea.hbm %s4015_s25, 32 }
 0xb28   :  { %p2933_p5 = scmp.ne.s32.totalorder %s4015_s25, %s2932_s24  ;;  %p2936_p6 = scmp.lt.u32.totalorder %s2932_s24, %s4015_s25 }
 0xb2a   :  { %p2938_p7 = pnand %p2936_p6, %p2933_p5 }
 0xb2c   :  { %2941 = shalt.err (!%p2938_p7)
}
 0xb2d   :  { %2375 = dma.vmem_to_hbm [thread:$0]  %s2373_s16, 32, %s4015_s25, [#allocation3]  }
 0xb2e   :  { %2942 = dma.done.wait [#allocation3], 32  }
 0xb2f   :  { %2943 = vsyncadd [#allocation3], 4294967264 }
 0xb30   :  { %2379 = vsyncpa [#allocation3], 1 }

</bundles_post_ra>
